<compile_context>
chip_gen: v7x
topology: tpu7x:2x2x1
jax: 0.10.0
libtpu: 0.0.40
codegen_flags: <defaults>
</compile_context>

<pallas_src>
import numpy as np

import jax
import jax.numpy as jnp
from jax.experimental import pallas as pl
from jax.experimental.pallas import tpu as pltpu

# ---------------- hyper-parameters (small, consistent with the module) -------
BATCH = 2            # b
HIDDEN = 32          # hidden_channels
LATENT = 16          # latent_channels
NUM_BLOCKS = 4       # num_blocks
NODES = 16           # n (spatial)
TSTEPS = 8           # t
POS = BATCH * NODES * TSTEPS      # 256 positions -> lane axis


# ------------------------------- Pallas kernel -------------------------------
def _genmodel_kernel(
    d_ref,       # (L, H, P)   index j == block j == layer L-1-j (top-down order)
    eps_ref,     # (L, Z, P)
    wid_ref,     # (L, Z, H)   enc_in weight, d-part
    wiz_ref,     # (L, Z, Z)   enc_in weight, z-part (zeros for block 0)
    bi_ref,      # (L, Z, 1)
    wh_ref,      # (L, Z, Z)   enc_hidden[0]
    bh_ref,      # (L, Z, 1)
    wo_ref,      # (L, 2Z, Z)  rows [0:Z) -> mu head, rows [Z:2Z) -> logsigma head
    bo_ref,      # (L, 2Z, 1)
    z_ref, mu_ref, sig_ref,    # (L, Z, P) each, in torch stacking order
):
    def mm(w, x):
        return jnp.dot(w, x, preferred_element_type=jnp.float32)

    z = None
    for j in range(NUM_BLOCKS):                       # static unroll; z chain is serial
        x = d_ref[j]                                  # (H, P)
        h = mm(wid_ref[j], x) + bi_ref[j]             # enc_in (d-part)
        if j > 0:                                     # enc_in on cat((d, z)) == split-weight
            h = h + mm(wiz_ref[j], z)
        h = jnp.maximum(mm(wh_ref[j], h) + bh_ref[j], 0.0)   # enc_hidden[0] + ReLU
        o = mm(wo_ref[j], h) + bo_ref[j]              # fused mu / logsigma heads (2Z, P)
        mu = jnp.minimum(o[:LATENT], 10.0)
        logsig = jnp.minimum(o[LATENT:], 10.0)
        sig = jnp.exp(logsig) + 0.001
        z = mu + eps_ref[j] * sig                     # reparameterize
        z_ref[j] = z
        mu_ref[j] = mu
        sig_ref[j] = sig


# ------------------------------ JAX glue / wrapper ----------------------------
def generative_model_forward(d_list, params, eps):
    """d_list: list of L arrays (B, HIDDEN, N, T); eps: (L, B, LATENT, N, T)."""
    L = len(d_list)
    B, H, N, T = d_list[0].shape
    Z = LATENT
    P = B * N * T

    # block j consumes layers[L-1-j] and d[L-1-j]  (torch output order)
    order = list(reversed(range(L)))

    # channels-on-sublanes x positions-on-lanes layout
    d_k = jnp.stack(
        [jnp.transpose(d_list[i], (1, 0, 2, 3)).reshape(H, P) for i in order]
    ).astype(jnp.float32)                                        # (L, H, P)
    eps_k = jnp.transpose(eps, (0, 2, 1, 3, 4)).reshape(L, Z, P).astype(jnp.float32)

    def win_d(p):
        return p['w_in'][:, :H]

    def win_z(p):
        w = p['w_in']
        return w[:, H:] if w.shape[1] > H else jnp.zeros((Z, Z), jnp.float32)

    wid = jnp.stack([win_d(params[i]) for i in order])           # (L, Z, H)
    wiz = jnp.stack([win_z(params[i]) for i in order])           # (L, Z, Z)
    bi = jnp.stack([params[i]['b_in'] for i in order])[..., None]
    wh = jnp.stack([params[i]['w_hid'] for i in order])
    bh = jnp.stack([params[i]['b_hid'] for i in order])[..., None]
    wo = jnp.stack([jnp.concatenate([params[i]['w_o1'], params[i]['w_o2']], 0)
                    for i in order])                             # (L, 2Z, Z)
    bo = jnp.stack([jnp.concatenate([params[i]['b_o1'], params[i]['b_o2']], 0)
                    for i in order])[..., None]                  # (L, 2Z, 1)

    inputs = [d_k, eps_k, wid, wiz, bi, wh, bh, wo, bo]

    def full_spec(a):
        nd = a.ndim
        return pl.BlockSpec(a.shape, lambda i, _nd=nd: (0,) * _nd)

    out_sds = jax.ShapeDtypeStruct((L, Z, P), jnp.float32)
    z_k, mu_k, sig_k = pl.pallas_call(
        _genmodel_kernel,
        out_shape=(out_sds, out_sds, out_sds),
        grid=(1,),
        in_specs=[full_spec(a) for a in inputs],
        out_specs=(pl.BlockSpec((L, Z, P), lambda i: (0, 0, 0)),) * 3,
        compiler_params=pltpu.CompilerParams(dimension_semantics=("arbitrary",)),
    )(*inputs)

    def unpack(a):   # (L, Z, P) -> (L, B, Z, N, T)
        return jnp.transpose(a.reshape(L, Z, B, N, T), (0, 2, 1, 3, 4))

    return unpack(z_k), unpack(mu_k), unpack(sig_k)


# --------------------------- pure-JAX reference (check) ----------------------
def reference_forward(d_list, params, eps):
    def conv1x1(w, b, h):     # w: (Cout, Cin), h: (B, Cin, N, T)
        return jnp.einsum('oi,bint->bont', w, h) + b[None, :, None, None]

    def latent_layer(lp, x):
        h = conv1x1(lp['w_in'], lp['b_in'], x)                   # enc_in
        h = conv1x1(lp['w_hid'], lp['b_hid'], h)                 # enc_hidden[0]
        h = jax.nn.relu(h)                                       # enc_hidden[1]
        mu = jnp.minimum(conv1x1(lp['w_o1'], lp['b_o1'], h), 10.0)
        logsig = jnp.minimum(conv1x1(lp['w_o2'], lp['b_o2'], h), 10.0)
        return mu, logsig

    mu, logsig = latent_layer(params[-1], d_list[-1])
    sigma = jnp.exp(logsig) + 0.001
    z = mu + eps[0] * sigma
    zs, mus, sigmas = [z], [mu], [sigma]
    for j, i in enumerate(reversed(range(len(params) - 1)), start=1):
        x = jnp.concatenate([d_list[i], zs[-1]], axis=1)
        mu, logsig = latent_layer(params[i], x)
        sigma = jnp.exp(logsig) + 0.001
        z = mu + eps[j] * sigma
        zs.append(z); mus.append(mu); sigmas.append(sigma)
    return jnp.stack(zs), jnp.stack(mus), jnp.stack(sigmas)


# ------------------------------- parameter init -------------------------------
def init_params(key):
    params = []
    for i in range(NUM_BLOCKS):
        cin = HIDDEN + (LATENT if i < NUM_BLOCKS - 1 else 0)    # last layer: latent_dim_in = 0
        ks = jax.random.split(jax.random.fold_in(key, i), 8)

        def w(k, co, ci):
            return jax.random.normal(k, (co, ci), jnp.float32) / np.sqrt(ci)

        def b(k, co):
            return 0.05 * jax.random.normal(k, (co,), jnp.float32)

        params.append({
            'w_in': w(ks[0], LATENT, cin),  'b_in': b(ks[1], LATENT),
            'w_hid': w(ks[2], LATENT, LATENT), 'b_hid': b(ks[3], LATENT),
            'w_o1': w(ks[4], LATENT, LATENT), 'b_o1': b(ks[5], LATENT),
            'w_o2': w(ks[6], LATENT, LATENT), 'b_o2': b(ks[7], LATENT),
        })
    return params


# ------------------------------------ main ------------------------------------
if __name__ == "__main__":
    key = jax.random.PRNGKey(0)
    kd, ke, kp = jax.random.split(key, 3)

    d_list = [
        jax.random.normal(jax.random.fold_in(kd, i),
                          (BATCH, HIDDEN, NODES, TSTEPS), jnp.float32)
        for i in range(NUM_BLOCKS)
    ]
    eps = jax.random.normal(ke, (NUM_BLOCKS, BATCH, LATENT, NODES, TSTEPS), jnp.float32)
    params = init_params(kp)

    z, mus, sigmas = generative_model_forward(d_list, params, eps)
    z = jax.block_until_ready(z)
    mus = jax.block_until_ready(mus)
    sigmas = jax.block_until_ready(sigmas)

    z_ref, mu_ref, sig_ref = reference_forward(d_list, params, eps)
    z_ref = jax.block_until_ready(z_ref)

    assert z.shape == (NUM_BLOCKS, BATCH, LATENT, NODES, TSTEPS)
    assert mus.shape == z.shape and sigmas.shape == z.shape
    np.testing.assert_allclose(np.asarray(z), np.asarray(z_ref), rtol=2e-2, atol=2e-2)
    np.testing.assert_allclose(np.asarray(mus), np.asarray(mu_ref), rtol=2e-2, atol=2e-2)
    np.testing.assert_allclose(np.asarray(sigmas), np.asarray(sig_ref), rtol=2e-2, atol=2e-2)
    print("KERNEL_OK")
</pallas_src>

<mosaic_0001>
module attributes {stable_mosaic.version = 11 : i64} {
  func.func @_genmodel_kernel(%arg0: i32, %arg1: memref<4x32x256xf32, #tpu.memory_space<vmem>>, %arg2: memref<4x16x256xf32, #tpu.memory_space<vmem>>, %arg3: memref<4x16x32xf32, #tpu.memory_space<vmem>>, %arg4: memref<4x16x16xf32, #tpu.memory_space<vmem>>, %arg5: memref<4x16x1xf32, #tpu.memory_space<vmem>>, %arg6: memref<4x16x16xf32, #tpu.memory_space<vmem>>, %arg7: memref<4x16x1xf32, #tpu.memory_space<vmem>>, %arg8: memref<4x32x16xf32, #tpu.memory_space<vmem>>, %arg9: memref<4x32x1xf32, #tpu.memory_space<vmem>>, %arg10: memref<4x16x256xf32, #tpu.memory_space<vmem>>, %arg11: memref<4x16x256xf32, #tpu.memory_space<vmem>>, %arg12: memref<4x16x256xf32, #tpu.memory_space<vmem>>) attributes {dimension_semantics = [#tpu.dimension_semantics<arbitrary>], iteration_bounds = array<i64: 1>, scalar_prefetch = 0 : i64, scratch_operands = 0 : i64, tpu.core_type = #tpu.core_type<tc>, window_params = [{pipeline_mode = #tpu.pipeline_mode<synchronous>, transform_indices = @transform_0, window_bounds = array<i64: 4, 32, 256>}, {pipeline_mode = #tpu.pipeline_mode<synchronous>, transform_indices = @transform_1, window_bounds = array<i64: 4, 16, 256>}, {pipeline_mode = #tpu.pipeline_mode<synchronous>, transform_indices = @transform_2, window_bounds = array<i64: 4, 16, 32>}, {pipeline_mode = #tpu.pipeline_mode<synchronous>, transform_indices = @transform_3, window_bounds = array<i64: 4, 16, 16>}, {pipeline_mode = #tpu.pipeline_mode<synchronous>, transform_indices = @transform_4, window_bounds = array<i64: 4, 16, 1>}, {pipeline_mode = #tpu.pipeline_mode<synchronous>, transform_indices = @transform_5, window_bounds = array<i64: 4, 16, 16>}, {pipeline_mode = #tpu.pipeline_mode<synchronous>, transform_indices = @transform_6, window_bounds = array<i64: 4, 16, 1>}, {pipeline_mode = #tpu.pipeline_mode<synchronous>, transform_indices = @transform_7, window_bounds = array<i64: 4, 32, 16>}, {pipeline_mode = #tpu.pipeline_mode<synchronous>, transform_indices = @transform_8, window_bounds = array<i64: 4, 32, 1>}, {pipeline_mode = #tpu.pipeline_mode<synchronous>, transform_indices = @transform_9, window_bounds = array<i64: 4, 16, 256>}, {pipeline_mode = #tpu.pipeline_mode<synchronous>, transform_indices = @transform_10, window_bounds = array<i64: 4, 16, 256>}, {pipeline_mode = #tpu.pipeline_mode<synchronous>, transform_indices = @transform_11, window_bounds = array<i64: 4, 16, 256>}]} {
    %c0 = arith.constant 0 : index
    %c0_0 = arith.constant 0 : index
    %c0_1 = arith.constant 0 : index
    %0 = vector.load %arg1[%c0, %c0_0, %c0_1] : memref<4x32x256xf32, #tpu.memory_space<vmem>>, vector<1x32x256xf32>
    %1 = vector.shape_cast %0 : vector<1x32x256xf32> to vector<32x256xf32>
    %c0_2 = arith.constant 0 : index
    %c0_3 = arith.constant 0 : index
    %c0_4 = arith.constant 0 : index
    %2 = vector.load %arg3[%c0_2, %c0_3, %c0_4] : memref<4x16x32xf32, #tpu.memory_space<vmem>>, vector<1x16x32xf32>
    %3 = vector.shape_cast %2 : vector<1x16x32xf32> to vector<16x32xf32>
    %cst = arith.constant dense<0.000000e+00> : vector<16x256xf32>
    %4 = tpu.matmul %3, %1, %cst {dimension_numbers = #tpu.dot_dimension_numbers<[1], [0], [0], [1], [0, 0, 1, 1], [], []>} : vector<16x32xf32>, vector<32x256xf32>, vector<16x256xf32> -> vector<16x256xf32>
    %c0_5 = arith.constant 0 : index
    %c0_6 = arith.constant 0 : index
    %c0_7 = arith.constant 0 : index
    %5 = vector.load %arg5[%c0_5, %c0_6, %c0_7] : memref<4x16x1xf32, #tpu.memory_space<vmem>>, vector<1x16x1xf32>
    %6 = vector.shape_cast %5 : vector<1x16x1xf32> to vector<16x1xf32>
    %7 = vector.broadcast %6 : vector<16x1xf32> to vector<16x256xf32>
    %8 = arith.addf %4, %7 : vector<16x256xf32>
    %c0_8 = arith.constant 0 : index
    %c0_9 = arith.constant 0 : index
    %c0_10 = arith.constant 0 : index
    %9 = vector.load %arg6[%c0_8, %c0_9, %c0_10] : memref<4x16x16xf32, #tpu.memory_space<vmem>>, vector<1x16x16xf32>
    %10 = vector.shape_cast %9 : vector<1x16x16xf32> to vector<16x16xf32>
    %cst_11 = arith.constant dense<0.000000e+00> : vector<16x256xf32>
    %11 = tpu.matmul %10, %8, %cst_11 {dimension_numbers = #tpu.dot_dimension_numbers<[1], [0], [0], [1], [0, 0, 1, 1], [], []>} : vector<16x16xf32>, vector<16x256xf32>, vector<16x256xf32> -> vector<16x256xf32>
    %c0_12 = arith.constant 0 : index
    %c0_13 = arith.constant 0 : index
    %c0_14 = arith.constant 0 : index
    %12 = vector.load %arg7[%c0_12, %c0_13, %c0_14] : memref<4x16x1xf32, #tpu.memory_space<vmem>>, vector<1x16x1xf32>
    %13 = vector.shape_cast %12 : vector<1x16x1xf32> to vector<16x1xf32>
    %14 = vector.broadcast %13 : vector<16x1xf32> to vector<16x256xf32>
    %15 = arith.addf %11, %14 : vector<16x256xf32>
    %cst_15 = arith.constant 0.000000e+00 : f32
    %16 = vector.broadcast %cst_15 : f32 to vector<16x256xf32>
    %17 = arith.maximumf %15, %16 : vector<16x256xf32>
    %c0_16 = arith.constant 0 : index
    %c0_17 = arith.constant 0 : index
    %c0_18 = arith.constant 0 : index
    %18 = vector.load %arg8[%c0_16, %c0_17, %c0_18] : memref<4x32x16xf32, #tpu.memory_space<vmem>>, vector<1x32x16xf32>
    %19 = vector.shape_cast %18 : vector<1x32x16xf32> to vector<32x16xf32>
    %cst_19 = arith.constant dense<0.000000e+00> : vector<32x256xf32>
    %20 = tpu.matmul %19, %17, %cst_19 {dimension_numbers = #tpu.dot_dimension_numbers<[1], [0], [0], [1], [0, 0, 1, 1], [], []>} : vector<32x16xf32>, vector<16x256xf32>, vector<32x256xf32> -> vector<32x256xf32>
    %c0_20 = arith.constant 0 : index
    %c0_21 = arith.constant 0 : index
    %c0_22 = arith.constant 0 : index
    %21 = vector.load %arg9[%c0_20, %c0_21, %c0_22] : memref<4x32x1xf32, #tpu.memory_space<vmem>>, vector<1x32x1xf32>
    %22 = vector.shape_cast %21 : vector<1x32x1xf32> to vector<32x1xf32>
    %23 = vector.broadcast %22 : vector<32x1xf32> to vector<32x256xf32>
    %24 = arith.addf %20, %23 : vector<32x256xf32>
    %25 = vector.extract_strided_slice %24 {offsets = [0, 0], sizes = [16, 256], strides = [1, 1]} : vector<32x256xf32> to vector<16x256xf32>
    %cst_23 = arith.constant 1.000000e+01 : f32
    %26 = vector.broadcast %cst_23 : f32 to vector<16x256xf32>
    %27 = arith.minimumf %25, %26 : vector<16x256xf32>
    %28 = vector.extract_strided_slice %24 {offsets = [16, 0], sizes = [16, 256], strides = [1, 1]} : vector<32x256xf32> to vector<16x256xf32>
    %cst_24 = arith.constant 1.000000e+01 : f32
    %29 = vector.broadcast %cst_24 : f32 to vector<16x256xf32>
    %30 = arith.minimumf %28, %29 : vector<16x256xf32>
    %31 = math.exp %30 : vector<16x256xf32>
    %cst_25 = arith.constant 1.000000e-03 : f32
    %32 = vector.broadcast %cst_25 : f32 to vector<16x256xf32>
    %33 = arith.addf %31, %32 : vector<16x256xf32>
    %c0_26 = arith.constant 0 : index
    %c0_27 = arith.constant 0 : index
    %c0_28 = arith.constant 0 : index
    %34 = vector.load %arg2[%c0_26, %c0_27, %c0_28] : memref<4x16x256xf32, #tpu.memory_space<vmem>>, vector<1x16x256xf32>
    %35 = vector.shape_cast %34 : vector<1x16x256xf32> to vector<16x256xf32>
    %36 = arith.mulf %35, %33 : vector<16x256xf32>
    %37 = arith.addf %27, %36 : vector<16x256xf32>
    %c0_29 = arith.constant 0 : index
    %c0_30 = arith.constant 0 : index
    %c0_31 = arith.constant 0 : index
    %38 = vector.load %arg10[%c0_29, %c0_30, %c0_31] : memref<4x16x256xf32, #tpu.memory_space<vmem>>, vector<1x16x256xf32>
    %39 = vector.shape_cast %38 : vector<1x16x256xf32> to vector<16x256xf32>
    %40 = vector.shape_cast %37 : vector<16x256xf32> to vector<1x16x256xf32>
    tpu.vector_store %arg10[%c0_29, %c0_30, %c0_31], %40 {strides = array<i32>} : memref<4x16x256xf32, #tpu.memory_space<vmem>>, vector<1x16x256xf32>,
    %c0_32 = arith.constant 0 : index
    %c0_33 = arith.constant 0 : index
    %c0_34 = arith.constant 0 : index
    %41 = vector.load %arg11[%c0_32, %c0_33, %c0_34] : memref<4x16x256xf32, #tpu.memory_space<vmem>>, vector<1x16x256xf32>
    %42 = vector.shape_cast %41 : vector<1x16x256xf32> to vector<16x256xf32>
    %43 = vector.shape_cast %27 : vector<16x256xf32> to vector<1x16x256xf32>
    tpu.vector_store %arg11[%c0_32, %c0_33, %c0_34], %43 {strides = array<i32>} : memref<4x16x256xf32, #tpu.memory_space<vmem>>, vector<1x16x256xf32>,
    %c0_35 = arith.constant 0 : index
    %c0_36 = arith.constant 0 : index
    %c0_37 = arith.constant 0 : index
    %44 = vector.load %arg12[%c0_35, %c0_36, %c0_37] : memref<4x16x256xf32, #tpu.memory_space<vmem>>, vector<1x16x256xf32>
    %45 = vector.shape_cast %44 : vector<1x16x256xf32> to vector<16x256xf32>
    %46 = vector.shape_cast %33 : vector<16x256xf32> to vector<1x16x256xf32>
    tpu.vector_store %arg12[%c0_35, %c0_36, %c0_37], %46 {strides = array<i32>} : memref<4x16x256xf32, #tpu.memory_space<vmem>>, vector<1x16x256xf32>,
    %c1 = arith.constant 1 : index
    %c0_38 = arith.constant 0 : index
    %c0_39 = arith.constant 0 : index
    %47 = vector.load %arg1[%c1, %c0_38, %c0_39] : memref<4x32x256xf32, #tpu.memory_space<vmem>>, vector<1x32x256xf32>
    %48 = vector.shape_cast %47 : vector<1x32x256xf32> to vector<32x256xf32>
    %c1_40 = arith.constant 1 : index
    %c0_41 = arith.constant 0 : index
    %c0_42 = arith.constant 0 : index
    %49 = vector.load %arg3[%c1_40, %c0_41, %c0_42] : memref<4x16x32xf32, #tpu.memory_space<vmem>>, vector<1x16x32xf32>
    %50 = vector.shape_cast %49 : vector<1x16x32xf32> to vector<16x32xf32>
    %cst_43 = arith.constant dense<0.000000e+00> : vector<16x256xf32>
    %51 = tpu.matmul %50, %48, %cst_43 {dimension_numbers = #tpu.dot_dimension_numbers<[1], [0], [0], [1], [0, 0, 1, 1], [], []>} : vector<16x32xf32>, vector<32x256xf32>, vector<16x256xf32> -> vector<16x256xf32>
    %c1_44 = arith.constant 1 : index
    %c0_45 = arith.constant 0 : index
    %c0_46 = arith.constant 0 : index
    %52 = vector.load %arg5[%c1_44, %c0_45, %c0_46] : memref<4x16x1xf32, #tpu.memory_space<vmem>>, vector<1x16x1xf32>
    %53 = vector.shape_cast %52 : vector<1x16x1xf32> to vector<16x1xf32>
    %54 = vector.broadcast %53 : vector<16x1xf32> to vector<16x256xf32>
    %55 = arith.addf %51, %54 : vector<16x256xf32>
    %c1_47 = arith.constant 1 : index
    %c0_48 = arith.constant 0 : index
    %c0_49 = arith.constant 0 : index
    %56 = vector.load %arg4[%c1_47, %c0_48, %c0_49] : memref<4x16x16xf32, #tpu.memory_space<vmem>>, vector<1x16x16xf32>
    %57 = vector.shape_cast %56 : vector<1x16x16xf32> to vector<16x16xf32>
    %cst_50 = arith.constant dense<0.000000e+00> : vector<16x256xf32>
    %58 = tpu.matmul %57, %37, %cst_50 {dimension_numbers = #tpu.dot_dimension_numbers<[1], [0], [0], [1], [0, 0, 1, 1], [], []>} : vector<16x16xf32>, vector<16x256xf32>, vector<16x256xf32> -> vector<16x256xf32>
    %59 = arith.addf %55, %58 : vector<16x256xf32>
    %c1_51 = arith.constant 1 : index
    %c0_52 = arith.constant 0 : index
    %c0_53 = arith.constant 0 : index
    %60 = vector.load %arg6[%c1_51, %c0_52, %c0_53] : memref<4x16x16xf32, #tpu.memory_space<vmem>>, vector<1x16x16xf32>
    %61 = vector.shape_cast %60 : vector<1x16x16xf32> to vector<16x16xf32>
    %cst_54 = arith.constant dense<0.000000e+00> : vector<16x256xf32>
    %62 = tpu.matmul %61, %59, %cst_54 {dimension_numbers = #tpu.dot_dimension_numbers<[1], [0], [0], [1], [0, 0, 1, 1], [], []>} : vector<16x16xf32>, vector<16x256xf32>, vector<16x256xf32> -> vector<16x256xf32>
    %c1_55 = arith.constant 1 : index
    %c0_56 = arith.constant 0 : index
    %c0_57 = arith.constant 0 : index
    %63 = vector.load %arg7[%c1_55, %c0_56, %c0_57] : memref<4x16x1xf32, #tpu.memory_space<vmem>>, vector<1x16x1xf32>
    %64 = vector.shape_cast %63 : vector<1x16x1xf32> to vector<16x1xf32>
    %65 = vector.broadcast %64 : vector<16x1xf32> to vector<16x256xf32>
    %66 = arith.addf %62, %65 : vector<16x256xf32>
    %cst_58 = arith.constant 0.000000e+00 : f32
    %67 = vector.broadcast %cst_58 : f32 to vector<16x256xf32>
    %68 = arith.maximumf %66, %67 : vector<16x256xf32>
    %c1_59 = arith.constant 1 : index
    %c0_60 = arith.constant 0 : index
    %c0_61 = arith.constant 0 : index
    %69 = vector.load %arg8[%c1_59, %c0_60, %c0_61] : memref<4x32x16xf32, #tpu.memory_space<vmem>>, vector<1x32x16xf32>
    %70 = vector.shape_cast %69 : vector<1x32x16xf32> to vector<32x16xf32>
    %cst_62 = arith.constant dense<0.000000e+00> : vector<32x256xf32>
    %71 = tpu.matmul %70, %68, %cst_62 {dimension_numbers = #tpu.dot_dimension_numbers<[1], [0], [0], [1], [0, 0, 1, 1], [], []>} : vector<32x16xf32>, vector<16x256xf32>, vector<32x256xf32> -> vector<32x256xf32>
    %c1_63 = arith.constant 1 : index
    %c0_64 = arith.constant 0 : index
    %c0_65 = arith.constant 0 : index
    %72 = vector.load %arg9[%c1_63, %c0_64, %c0_65] : memref<4x32x1xf32, #tpu.memory_space<vmem>>, vector<1x32x1xf32>
    %73 = vector.shape_cast %72 : vector<1x32x1xf32> to vector<32x1xf32>
    %74 = vector.broadcast %73 : vector<32x1xf32> to vector<32x256xf32>
    %75 = arith.addf %71, %74 : vector<32x256xf32>
    %76 = vector.extract_strided_slice %75 {offsets = [0, 0], sizes = [16, 256], strides = [1, 1]} : vector<32x256xf32> to vector<16x256xf32>
    %cst_66 = arith.constant 1.000000e+01 : f32
    %77 = vector.broadcast %cst_66 : f32 to vector<16x256xf32>
    %78 = arith.minimumf %76, %77 : vector<16x256xf32>
    %79 = vector.extract_strided_slice %75 {offsets = [16, 0], sizes = [16, 256], strides = [1, 1]} : vector<32x256xf32> to vector<16x256xf32>
    %cst_67 = arith.constant 1.000000e+01 : f32
    %80 = vector.broadcast %cst_67 : f32 to vector<16x256xf32>
    %81 = arith.minimumf %79, %80 : vector<16x256xf32>
    %82 = math.exp %81 : vector<16x256xf32>
    %cst_68 = arith.constant 1.000000e-03 : f32
    %83 = vector.broadcast %cst_68 : f32 to vector<16x256xf32>
    %84 = arith.addf %82, %83 : vector<16x256xf32>
    %c1_69 = arith.constant 1 : index
    %c0_70 = arith.constant 0 : index
    %c0_71 = arith.constant 0 : index
    %85 = vector.load %arg2[%c1_69, %c0_70, %c0_71] : memref<4x16x256xf32, #tpu.memory_space<vmem>>, vector<1x16x256xf32>
    %86 = vector.shape_cast %85 : vector<1x16x256xf32> to vector<16x256xf32>
    %87 = arith.mulf %86, %84 : vector<16x256xf32>
    %88 = arith.addf %78, %87 : vector<16x256xf32>
    %c1_72 = arith.constant 1 : index
    %c0_73 = arith.constant 0 : index
    %c0_74 = arith.constant 0 : index
    %89 = vector.load %arg10[%c1_72, %c0_73, %c0_74] : memref<4x16x256xf32, #tpu.memory_space<vmem>>, vector<1x16x256xf32>
    %90 = vector.shape_cast %89 : vector<1x16x256xf32> to vector<16x256xf32>
    %91 = vector.shape_cast %88 : vector<16x256xf32> to vector<1x16x256xf32>
    tpu.vector_store %arg10[%c1_72, %c0_73, %c0_74], %91 {strides = array<i32>} : memref<4x16x256xf32, #tpu.memory_space<vmem>>, vector<1x16x256xf32>,
    %c1_75 = arith.constant 1 : index
    %c0_76 = arith.constant 0 : index
    %c0_77 = arith.constant 0 : index
    %92 = vector.load %arg11[%c1_75, %c0_76, %c0_77] : memref<4x16x256xf32, #tpu.memory_space<vmem>>, vector<1x16x256xf32>
    %93 = vector.shape_cast %92 : vector<1x16x256xf32> to vector<16x256xf32>
    %94 = vector.shape_cast %78 : vector<16x256xf32> to vector<1x16x256xf32>
    tpu.vector_store %arg11[%c1_75, %c0_76, %c0_77], %94 {strides = array<i32>} : memref<4x16x256xf32, #tpu.memory_space<vmem>>, vector<1x16x256xf32>,
    %c1_78 = arith.constant 1 : index
    %c0_79 = arith.constant 0 : index
    %c0_80 = arith.constant 0 : index
    %95 = vector.load %arg12[%c1_78, %c0_79, %c0_80] : memref<4x16x256xf32, #tpu.memory_space<vmem>>, vector<1x16x256xf32>
    %96 = vector.shape_cast %95 : vector<1x16x256xf32> to vector<16x256xf32>
    %97 = vector.shape_cast %84 : vector<16x256xf32> to vector<1x16x256xf32>
    tpu.vector_store %arg12[%c1_78, %c0_79, %c0_80], %97 {strides = array<i32>} : memref<4x16x256xf32, #tpu.memory_space<vmem>>, vector<1x16x256xf32>,
    %c2 = arith.constant 2 : index
    %c0_81 = arith.constant 0 : index
    %c0_82 = arith.constant 0 : index
    %98 = vector.load %arg1[%c2, %c0_81, %c0_82] : memref<4x32x256xf32, #tpu.memory_space<vmem>>, vector<1x32x256xf32>
    %99 = vector.shape_cast %98 : vector<1x32x256xf32> to vector<32x256xf32>
    %c2_83 = arith.constant 2 : index
    %c0_84 = arith.constant 0 : index
    %c0_85 = arith.constant 0 : index
    %100 = vector.load %arg3[%c2_83, %c0_84, %c0_85] : memref<4x16x32xf32, #tpu.memory_space<vmem>>, vector<1x16x32xf32>
    %101 = vector.shape_cast %100 : vector<1x16x32xf32> to vector<16x32xf32>
    %cst_86 = arith.constant dense<0.000000e+00> : vector<16x256xf32>
    %102 = tpu.matmul %101, %99, %cst_86 {dimension_numbers = #tpu.dot_dimension_numbers<[1], [0], [0], [1], [0, 0, 1, 1], [], []>} : vector<16x32xf32>, vector<32x256xf32>, vector<16x256xf32> -> vector<16x256xf32>
    %c2_87 = arith.constant 2 : index
    %c0_88 = arith.constant 0 : index
    %c0_89 = arith.constant 0 : index
    %103 = vector.load %arg5[%c2_87, %c0_88, %c0_89] : memref<4x16x1xf32, #tpu.memory_space<vmem>>, vector<1x16x1xf32>
    %104 = vector.shape_cast %103 : vector<1x16x1xf32> to vector<16x1xf32>
    %105 = vector.broadcast %104 : vector<16x1xf32> to vector<16x256xf32>
    %106 = arith.addf %102, %105 : vector<16x256xf32>
    %c2_90 = arith.constant 2 : index
    %c0_91 = arith.constant 0 : index
    %c0_92 = arith.constant 0 : index
    %107 = vector.load %arg4[%c2_90, %c0_91, %c0_92] : memref<4x16x16xf32, #tpu.memory_space<vmem>>, vector<1x16x16xf32>
    %108 = vector.shape_cast %107 : vector<1x16x16xf32> to vector<16x16xf32>
    %cst_93 = arith.constant dense<0.000000e+00> : vector<16x256xf32>
    %109 = tpu.matmul %108, %88, %cst_93 {dimension_numbers = #tpu.dot_dimension_numbers<[1], [0], [0], [1], [0, 0, 1, 1], [], []>} : vector<16x16xf32>, vector<16x256xf32>, vector<16x256xf32> -> vector<16x256xf32>
    %110 = arith.addf %106, %109 : vector<16x256xf32>
    %c2_94 = arith.constant 2 : index
    %c0_95 = arith.constant 0 : index
    %c0_96 = arith.constant 0 : index
    %111 = vector.load %arg6[%c2_94, %c0_95, %c0_96] : memref<4x16x16xf32, #tpu.memory_space<vmem>>, vector<1x16x16xf32>
    %112 = vector.shape_cast %111 : vector<1x16x16xf32> to vector<16x16xf32>
    %cst_97 = arith.constant dense<0.000000e+00> : vector<16x256xf32>
    %113 = tpu.matmul %112, %110, %cst_97 {dimension_numbers = #tpu.dot_dimension_numbers<[1], [0], [0], [1], [0, 0, 1, 1], [], []>} : vector<16x16xf32>, vector<16x256xf32>, vector<16x256xf32> -> vector<16x256xf32>
    %c2_98 = arith.constant 2 : index
    %c0_99 = arith.constant 0 : index
    %c0_100 = arith.constant 0 : index
    %114 = vector.load %arg7[%c2_98, %c0_99, %c0_100] : memref<4x16x1xf32, #tpu.memory_space<vmem>>, vector<1x16x1xf32>
    %115 = vector.shape_cast %114 : vector<1x16x1xf32> to vector<16x1xf32>
    %116 = vector.broadcast %115 : vector<16x1xf32> to vector<16x256xf32>
    %117 = arith.addf %113, %116 : vector<16x256xf32>
    %cst_101 = arith.constant 0.000000e+00 : f32
    %118 = vector.broadcast %cst_101 : f32 to vector<16x256xf32>
    %119 = arith.maximumf %117, %118 : vector<16x256xf32>
    %c2_102 = arith.constant 2 : index
    %c0_103 = arith.constant 0 : index
    %c0_104 = arith.constant 0 : index
    %120 = vector.load %arg8[%c2_102, %c0_103, %c0_104] : memref<4x32x16xf32, #tpu.memory_space<vmem>>, vector<1x32x16xf32>
    %121 = vector.shape_cast %120 : vector<1x32x16xf32> to vector<32x16xf32>
    %cst_105 = arith.constant dense<0.000000e+00> : vector<32x256xf32>
    %122 = tpu.matmul %121, %119, %cst_105 {dimension_numbers = #tpu.dot_dimension_numbers<[1], [0], [0], [1], [0, 0, 1, 1], [], []>} : vector<32x16xf32>, vector<16x256xf32>, vector<32x256xf32> -> vector<32x256xf32>
    %c2_106 = arith.constant 2 : index
    %c0_107 = arith.constant 0 : index
    %c0_108 = arith.constant 0 : index
    %123 = vector.load %arg9[%c2_106, %c0_107, %c0_108] : memref<4x32x1xf32, #tpu.memory_space<vmem>>, vector<1x32x1xf32>
    %124 = vector.shape_cast %123 : vector<1x32x1xf32> to vector<32x1xf32>
    %125 = vector.broadcast %124 : vector<32x1xf32> to vector<32x256xf32>
    %126 = arith.addf %122, %125 : vector<32x256xf32>
    %127 = vector.extract_strided_slice %126 {offsets = [0, 0], sizes = [16, 256], strides = [1, 1]} : vector<32x256xf32> to vector<16x256xf32>
    %cst_109 = arith.constant 1.000000e+01 : f32
    %128 = vector.broadcast %cst_109 : f32 to vector<16x256xf32>
    %129 = arith.minimumf %127, %128 : vector<16x256xf32>
    %130 = vector.extract_strided_slice %126 {offsets = [16, 0], sizes = [16, 256], strides = [1, 1]} : vector<32x256xf32> to vector<16x256xf32>
    %cst_110 = arith.constant 1.000000e+01 : f32
    %131 = vector.broadcast %cst_110 : f32 to vector<16x256xf32>
    %132 = arith.minimumf %130, %131 : vector<16x256xf32>
    %133 = math.exp %132 : vector<16x256xf32>
    %cst_111 = arith.constant 1.000000e-03 : f32
    %134 = vector.broadcast %cst_111 : f32 to vector<16x256xf32>
    %135 = arith.addf %133, %134 : vector<16x256xf32>
    %c2_112 = arith.constant 2 : index
    %c0_113 = arith.constant 0 : index
    %c0_114 = arith.constant 0 : index
    %136 = vector.load %arg2[%c2_112, %c0_113, %c0_114] : memref<4x16x256xf32, #tpu.memory_space<vmem>>, vector<1x16x256xf32>
    %137 = vector.shape_cast %136 : vector<1x16x256xf32> to vector<16x256xf32>
    %138 = arith.mulf %137, %135 : vector<16x256xf32>
    %139 = arith.addf %129, %138 : vector<16x256xf32>
    %c2_115 = arith.constant 2 : index
    %c0_116 = arith.constant 0 : index
    %c0_117 = arith.constant 0 : index
    %140 = vector.load %arg10[%c2_115, %c0_116, %c0_117] : memref<4x16x256xf32, #tpu.memory_space<vmem>>, vector<1x16x256xf32>
    %141 = vector.shape_cast %140 : vector<1x16x256xf32> to vector<16x256xf32>
    %142 = vector.shape_cast %139 : vector<16x256xf32> to vector<1x16x256xf32>
    tpu.vector_store %arg10[%c2_115, %c0_116, %c0_117], %142 {strides = array<i32>} : memref<4x16x256xf32, #tpu.memory_space<vmem>>, vector<1x16x256xf32>,
    %c2_118 = arith.constant 2 : index
    %c0_119 = arith.constant 0 : index
    %c0_120 = arith.constant 0 : index
    %143 = vector.load %arg11[%c2_118, %c0_119, %c0_120] : memref<4x16x256xf32, #tpu.memory_space<vmem>>, vector<1x16x256xf32>
    %144 = vector.shape_cast %143 : vector<1x16x256xf32> to vector<16x256xf32>
    %145 = vector.shape_cast %129 : vector<16x256xf32> to vector<1x16x256xf32>
    tpu.vector_store %arg11[%c2_118, %c0_119, %c0_120], %145 {strides = array<i32>} : memref<4x16x256xf32, #tpu.memory_space<vmem>>, vector<1x16x256xf32>,
    %c2_121 = arith.constant 2 : index
    %c0_122 = arith.constant 0 : index
    %c0_123 = arith.constant 0 : index
    %146 = vector.load %arg12[%c2_121, %c0_122, %c0_123] : memref<4x16x256xf32, #tpu.memory_space<vmem>>, vector<1x16x256xf32>
    %147 = vector.shape_cast %146 : vector<1x16x256xf32> to vector<16x256xf32>
    %148 = vector.shape_cast %135 : vector<16x256xf32> to vector<1x16x256xf32>
    tpu.vector_store %arg12[%c2_121, %c0_122, %c0_123], %148 {strides = array<i32>} : memref<4x16x256xf32, #tpu.memory_space<vmem>>, vector<1x16x256xf32>,
    %c3 = arith.constant 3 : index
    %c0_124 = arith.constant 0 : index
    %c0_125 = arith.constant 0 : index
    %149 = vector.load %arg1[%c3, %c0_124, %c0_125] : memref<4x32x256xf32, #tpu.memory_space<vmem>>, vector<1x32x256xf32>
    %150 = vector.shape_cast %149 : vector<1x32x256xf32> to vector<32x256xf32>
    %c3_126 = arith.constant 3 : index
    %c0_127 = arith.constant 0 : index
    %c0_128 = arith.constant 0 : index
    %151 = vector.load %arg3[%c3_126, %c0_127, %c0_128] : memref<4x16x32xf32, #tpu.memory_space<vmem>>, vector<1x16x32xf32>
    %152 = vector.shape_cast %151 : vector<1x16x32xf32> to vector<16x32xf32>
    %cst_129 = arith.constant dense<0.000000e+00> : vector<16x256xf32>
    %153 = tpu.matmul %152, %150, %cst_129 {dimension_numbers = #tpu.dot_dimension_numbers<[1], [0], [0], [1], [0, 0, 1, 1], [], []>} : vector<16x32xf32>, vector<32x256xf32>, vector<16x256xf32> -> vector<16x256xf32>
    %c3_130 = arith.constant 3 : index
    %c0_131 = arith.constant 0 : index
    %c0_132 = arith.constant 0 : index
    %154 = vector.load %arg5[%c3_130, %c0_131, %c0_132] : memref<4x16x1xf32, #tpu.memory_space<vmem>>, vector<1x16x1xf32>
    %155 = vector.shape_cast %154 : vector<1x16x1xf32> to vector<16x1xf32>
    %156 = vector.broadcast %155 : vector<16x1xf32> to vector<16x256xf32>
    %157 = arith.addf %153, %156 : vector<16x256xf32>
    %c3_133 = arith.constant 3 : index
    %c0_134 = arith.constant 0 : index
    %c0_135 = arith.constant 0 : index
    %158 = vector.load %arg4[%c3_133, %c0_134, %c0_135] : memref<4x16x16xf32, #tpu.memory_space<vmem>>, vector<1x16x16xf32>
    %159 = vector.shape_cast %158 : vector<1x16x16xf32> to vector<16x16xf32>
    %cst_136 = arith.constant dense<0.000000e+00> : vector<16x256xf32>
    %160 = tpu.matmul %159, %139, %cst_136 {dimension_numbers = #tpu.dot_dimension_numbers<[1], [0], [0], [1], [0, 0, 1, 1], [], []>} : vector<16x16xf32>, vector<16x256xf32>, vector<16x256xf32> -> vector<16x256xf32>
    %161 = arith.addf %157, %160 : vector<16x256xf32>
    %c3_137 = arith.constant 3 : index
    %c0_138 = arith.constant 0 : index
    %c0_139 = arith.constant 0 : index
    %162 = vector.load %arg6[%c3_137, %c0_138, %c0_139] : memref<4x16x16xf32, #tpu.memory_space<vmem>>, vector<1x16x16xf32>
    %163 = vector.shape_cast %162 : vector<1x16x16xf32> to vector<16x16xf32>
    %cst_140 = arith.constant dense<0.000000e+00> : vector<16x256xf32>
    %164 = tpu.matmul %163, %161, %cst_140 {dimension_numbers = #tpu.dot_dimension_numbers<[1], [0], [0], [1], [0, 0, 1, 1], [], []>} : vector<16x16xf32>, vector<16x256xf32>, vector<16x256xf32> -> vector<16x256xf32>
    %c3_141 = arith.constant 3 : index
    %c0_142 = arith.constant 0 : index
    %c0_143 = arith.constant 0 : index
    %165 = vector.load %arg7[%c3_141, %c0_142, %c0_143] : memref<4x16x1xf32, #tpu.memory_space<vmem>>, vector<1x16x1xf32>
    %166 = vector.shape_cast %165 : vector<1x16x1xf32> to vector<16x1xf32>
    %167 = vector.broadcast %166 : vector<16x1xf32> to vector<16x256xf32>
    %168 = arith.addf %164, %167 : vector<16x256xf32>
    %cst_144 = arith.constant 0.000000e+00 : f32
    %169 = vector.broadcast %cst_144 : f32 to vector<16x256xf32>
    %170 = arith.maximumf %168, %169 : vector<16x256xf32>
    %c3_145 = arith.constant 3 : index
    %c0_146 = arith.constant 0 : index
    %c0_147 = arith.constant 0 : index
    %171 = vector.load %arg8[%c3_145, %c0_146, %c0_147] : memref<4x32x16xf32, #tpu.memory_space<vmem>>, vector<1x32x16xf32>
    %172 = vector.shape_cast %171 : vector<1x32x16xf32> to vector<32x16xf32>
    %cst_148 = arith.constant dense<0.000000e+00> : vector<32x256xf32>
    %173 = tpu.matmul %172, %170, %cst_148 {dimension_numbers = #tpu.dot_dimension_numbers<[1], [0], [0], [1], [0, 0, 1, 1], [], []>} : vector<32x16xf32>, vector<16x256xf32>, vector<32x256xf32> -> vector<32x256xf32>
    %c3_149 = arith.constant 3 : index
    %c0_150 = arith.constant 0 : index
    %c0_151 = arith.constant 0 : index
    %174 = vector.load %arg9[%c3_149, %c0_150, %c0_151] : memref<4x32x1xf32, #tpu.memory_space<vmem>>, vector<1x32x1xf32>
    %175 = vector.shape_cast %174 : vector<1x32x1xf32> to vector<32x1xf32>
    %176 = vector.broadcast %175 : vector<32x1xf32> to vector<32x256xf32>
    %177 = arith.addf %173, %176 : vector<32x256xf32>
    %178 = vector.extract_strided_slice %177 {offsets = [0, 0], sizes = [16, 256], strides = [1, 1]} : vector<32x256xf32> to vector<16x256xf32>
    %cst_152 = arith.constant 1.000000e+01 : f32
    %179 = vector.broadcast %cst_152 : f32 to vector<16x256xf32>
    %180 = arith.minimumf %178, %179 : vector<16x256xf32>
    %181 = vector.extract_strided_slice %177 {offsets = [16, 0], sizes = [16, 256], strides = [1, 1]} : vector<32x256xf32> to vector<16x256xf32>
    %cst_153 = arith.constant 1.000000e+01 : f32
    %182 = vector.broadcast %cst_153 : f32 to vector<16x256xf32>
    %183 = arith.minimumf %181, %182 : vector<16x256xf32>
    %184 = math.exp %183 : vector<16x256xf32>
    %cst_154 = arith.constant 1.000000e-03 : f32
    %185 = vector.broadcast %cst_154 : f32 to vector<16x256xf32>
    %186 = arith.addf %184, %185 : vector<16x256xf32>
    %c3_155 = arith.constant 3 : index
    %c0_156 = arith.constant 0 : index
    %c0_157 = arith.constant 0 : index
    %187 = vector.load %arg2[%c3_155, %c0_156, %c0_157] : memref<4x16x256xf32, #tpu.memory_space<vmem>>, vector<1x16x256xf32>
    %188 = vector.shape_cast %187 : vector<1x16x256xf32> to vector<16x256xf32>
    %189 = arith.mulf %188, %186 : vector<16x256xf32>
    %190 = arith.addf %180, %189 : vector<16x256xf32>
    %c3_158 = arith.constant 3 : index
    %c0_159 = arith.constant 0 : index
    %c0_160 = arith.constant 0 : index
    %191 = vector.load %arg10[%c3_158, %c0_159, %c0_160] : memref<4x16x256xf32, #tpu.memory_space<vmem>>, vector<1x16x256xf32>
    %192 = vector.shape_cast %191 : vector<1x16x256xf32> to vector<16x256xf32>
    %193 = vector.shape_cast %190 : vector<16x256xf32> to vector<1x16x256xf32>
    tpu.vector_store %arg10[%c3_158, %c0_159, %c0_160], %193 {strides = array<i32>} : memref<4x16x256xf32, #tpu.memory_space<vmem>>, vector<1x16x256xf32>,
    %c3_161 = arith.constant 3 : index
    %c0_162 = arith.constant 0 : index
    %c0_163 = arith.constant 0 : index
    %194 = vector.load %arg11[%c3_161, %c0_162, %c0_163] : memref<4x16x256xf32, #tpu.memory_space<vmem>>, vector<1x16x256xf32>
    %195 = vector.shape_cast %194 : vector<1x16x256xf32> to vector<16x256xf32>
    %196 = vector.shape_cast %180 : vector<16x256xf32> to vector<1x16x256xf32>
    tpu.vector_store %arg11[%c3_161, %c0_162, %c0_163], %196 {strides = array<i32>} : memref<4x16x256xf32, #tpu.memory_space<vmem>>, vector<1x16x256xf32>,
    %c3_164 = arith.constant 3 : index
    %c0_165 = arith.constant 0 : index
    %c0_166 = arith.constant 0 : index
    %197 = vector.load %arg12[%c3_164, %c0_165, %c0_166] : memref<4x16x256xf32, #tpu.memory_space<vmem>>, vector<1x16x256xf32>
    %198 = vector.shape_cast %197 : vector<1x16x256xf32> to vector<16x256xf32>
    %199 = vector.shape_cast %186 : vector<16x256xf32> to vector<1x16x256xf32>
    tpu.vector_store %arg12[%c3_164, %c0_165, %c0_166], %199 {strides = array<i32>} : memref<4x16x256xf32, #tpu.memory_space<vmem>>, vector<1x16x256xf32>,
    return
  }
  func.func @transform_0(%arg0: i32) -> (i32, i32, i32) {
    %c0_i32 = arith.constant 0 : i32
    %c0_i32_0 = arith.constant 0 : i32
    %c0_i32_1 = arith.constant 0 : i32
    %c0_i32_2 = arith.constant 0 : i32
    return %c0_i32, %c0_i32_0, %c0_i32_1 : i32, i32, i32
  }
  func.func @transform_1(%arg0: i32) -> (i32, i32, i32) {
    %c0_i32 = arith.constant 0 : i32
    %c0_i32_0 = arith.constant 0 : i32
    %c0_i32_1 = arith.constant 0 : i32
    %c0_i32_2 = arith.constant 0 : i32
    return %c0_i32, %c0_i32_0, %c0_i32_1 : i32, i32, i32
  }
  func.func @transform_2(%arg0: i32) -> (i32, i32, i32) {
    %c0_i32 = arith.constant 0 : i32
    %c0_i32_0 = arith.constant 0 : i32
    %c0_i32_1 = arith.constant 0 : i32
    %c0_i32_2 = arith.constant 0 : i32
    return %c0_i32, %c0_i32_0, %c0_i32_1 : i32, i32, i32
  }
  func.func @transform_3(%arg0: i32) -> (i32, i32, i32) {
    %c0_i32 = arith.constant 0 : i32
    %c0_i32_0 = arith.constant 0 : i32
    %c0_i32_1 = arith.constant 0 : i32
    %c0_i32_2 = arith.constant 0 : i32
    return %c0_i32, %c0_i32_0, %c0_i32_1 : i32, i32, i32
  }
  func.func @transform_4(%arg0: i32) -> (i32, i32, i32) {
    %c0_i32 = arith.constant 0 : i32
    %c0_i32_0 = arith.constant 0 : i32
    %c0_i32_1 = arith.constant 0 : i32
    %c0_i32_2 = arith.constant 0 : i32
    return %c0_i32, %c0_i32_0, %c0_i32_1 : i32, i32, i32
  }
  func.func @transform_5(%arg0: i32) -> (i32, i32, i32) {
    %c0_i32 = arith.constant 0 : i32
    %c0_i32_0 = arith.constant 0 : i32
    %c0_i32_1 = arith.constant 0 : i32
    %c0_i32_2 = arith.constant 0 : i32
    return %c0_i32, %c0_i32_0, %c0_i32_1 : i32, i32, i32
  }
  func.func @transform_6(%arg0: i32) -> (i32, i32, i32) {
    %c0_i32 = arith.constant 0 : i32
    %c0_i32_0 = arith.constant 0 : i32
    %c0_i32_1 = arith.constant 0 : i32
    %c0_i32_2 = arith.constant 0 : i32
    return %c0_i32, %c0_i32_0, %c0_i32_1 : i32, i32, i32
  }
  func.func @transform_7(%arg0: i32) -> (i32, i32, i32) {
    %c0_i32 = arith.constant 0 : i32
    %c0_i32_0 = arith.constant 0 : i32
    %c0_i32_1 = arith.constant 0 : i32
    %c0_i32_2 = arith.constant 0 : i32
    return %c0_i32, %c0_i32_0, %c0_i32_1 : i32, i32, i32
  }
  func.func @transform_8(%arg0: i32) -> (i32, i32, i32) {
    %c0_i32 = arith.constant 0 : i32
    %c0_i32_0 = arith.constant 0 : i32
    %c0_i32_1 = arith.constant 0 : i32
    %c0_i32_2 = arith.constant 0 : i32
    return %c0_i32, %c0_i32_0, %c0_i32_1 : i32, i32, i32
  }
  func.func @transform_9(%arg0: i32) -> (i32, i32, i32) {
    %c0_i32 = arith.constant 0 : i32
    %c0_i32_0 = arith.constant 0 : i32
    %c0_i32_1 = arith.constant 0 : i32
    %c0_i32_2 = arith.constant 0 : i32
    return %c0_i32, %c0_i32_0, %c0_i32_1 : i32, i32, i32
  }
  func.func @transform_10(%arg0: i32) -> (i32, i32, i32) {
    %c0_i32 = arith.constant 0 : i32
    %c0_i32_0 = arith.constant 0 : i32
    %c0_i32_1 = arith.constant 0 : i32
    %c0_i32_2 = arith.constant 0 : i32
    return %c0_i32, %c0_i32_0, %c0_i32_1 : i32, i32, i32
  }
  func.func @transform_11(%arg0: i32) -> (i32, i32, i32) {
    %c0_i32 = arith.constant 0 : i32
    %c0_i32_0 = arith.constant 0 : i32
    %c0_i32_1 = arith.constant 0 : i32
    %c0_i32_2 = arith.constant 0 : i32
    return %c0_i32, %c0_i32_0, %c0_i32_1 : i32, i32, i32
  }
}

</mosaic_0001>

<bundles_post_ra>
// kernel: tpu_custom_call.1
= control target key start
LH: loop header
LB: loop body
LE: loop exit
PB: predicated region body
PF: predicated region fallthrough
CT: control target
= control target key end

     0   :  { %17 = vsyncpa [#allocation3], 0  ;;  %s2905_s0 = inlined_call_operand.vmem [shape: f32[4,32,256], index: 0, kind: input, shape index: {}]   ;;  %s2906_s1 = inlined_call_operand.vmem [shape: f32[4,16,256], index: 1, kind: input, shape index: {}]   ;;  %s2907_s2 = inlined_call_operand.hbm [shape: f32[4,16,32], index: 2, kind: input, shape index: {}]   ;;  %s2908_s3 = inlined_call_operand.hbm [shape: f32[4,16,16], index: 3, kind: input, shape index: {}]   ;;  %s2909_s4 = inlined_call_operand.vmem [shape: f32[4,16,1], index: 4, kind: input, shape index: {}]   ;;  %s2910_s5 = inlined_call_operand.hbm [shape: f32[4,16,16], index: 5, kind: input, shape index: {}]   ;;  %s2911_s6 = inlined_call_operand.vmem [shape: f32[4,16,1], index: 6, kind: input, shape index: {}]   ;;  %s2912_s7 = inlined_call_operand.vmem [shape: f32[4,32,16], index: 7, kind: input, shape index: {}]   ;;  %s2913_s8 = inlined_call_operand.vmem [shape: f32[4,32,1], index: 8, kind: input, shape index: {}]   ;;  %s2914_s9 = inlined_call_operand.hbm [shape: f32[4,16,256], index: 9, kind: output, shape index: {0}]   ;;  %s2915_s10 = inlined_call_operand.hbm [shape: f32[4,16,256], index: 10, kind: output, shape index: {1}]   ;;  %s2916_s11 = inlined_call_operand.hbm [shape: f32[4,16,256], index: 11, kind: output, shape index: {2}]  }
   0x1   :  { %18 = vsyncpa [#allocation6], 0 }
   0x2   :  { %19 = vsyncpa [#allocation4], 0 }
   0x3   :  { %20 = vsyncpa [#allocation10], 0  ;;  %s2344_s17 = smov [#allocation5]   ;;  %s2345_s19 = smov [#allocation2]  }
   0x4   :  { %s42_s18 = sshll.u32 %s2344_s17, 4  ;;  %s30_s20 = sshll.u32 %s2345_s19, 4  ;;  %s43_s18 = int_to_ptr.vmem [resolvable:$true] %s42_s18  ;;  %s2416_s20 = int_to_ptr.vmem [resolvable:$true] %s30_s20 }
   0x5   :  { %s2204_s23 = scalar_lea.hbm %s2908_s3, 1024 }
   0x6   :  { %p2205_p0 = scmp.ne.s32.totalorder %s2908_s3, %s2204_s23  ;;  %p2208_p1 = scmp.lt.u32.totalorder %s2204_s23, %s2908_s3 }
   0x8   :  { %p2210_p2 = pnand %p2208_p1, %p2205_p0 }
   0xa   :  { %2213 = shalt.err (!%p2210_p2)
}
   0xb   :  { %s2214_s28 = scalar_lea.vmem %s43_s18, 1024  ;;  %p2219_p4 = scmp.lt.s32.totalorder %s43_s18, %s43_s18 }
   0xc   :  { %p2215_p3 = scmp.ne.s32.totalorder %s43_s18, %s2214_s28  ;;  %p2220_p5 = scmp.lt.s32.totalorder %s2214_s28, %s2214_s28 }
   0xe   :  { %p2221_p6 = por %p2220_p5, %p2219_p4 }
  0x10   :  { %p2222_p7 = pnand %p2221_p6, %p2215_p3 }
  0x12   :  { %2225 = shalt.err (!%p2222_p7)
}
  0x13   :  { %s2346_s29 = smov 128   ;;  %s2347_s30 = smov 8  }
  0x14   :  { %48 = dma.hbm_to_vmem [thread:$0]  %s2908_s3, 1024, %s43_s18, [#allocation6], %s2346_s29, %s2346_s29, %s2347_s30  }
  0x15   :  { %s2226_s16 = scalar_lea.hbm %s2907_s2, 1024 }
  0x16   :  { %p2227_p8 = scmp.ne.s32.totalorder %s2907_s2, %s2226_s16  ;;  %p2230_p9 = scmp.lt.u32.totalorder %s2226_s16, %s2907_s2 }
  0x18   :  { %p2232_p10 = pnand %p2230_p9, %p2227_p8 }
  0x1a   :  { %2235 = shalt.err (!%p2232_p10)
}
  0x1b   :  { %s2236_s23 = scalar_lea.vmem %s2416_s20, 1024  ;;  %p2241_p12 = scmp.lt.s32.totalorder %s2416_s20, %s2416_s20 }
  0x1c   :  { %p2237_p11 = scmp.ne.s32.totalorder %s2416_s20, %s2236_s23  ;;  %p2242_p13 = scmp.lt.s32.totalorder %s2236_s23, %s2236_s23 }
  0x1e   :  { %p2243_p0 = por %p2242_p13, %p2241_p12 }
  0x20   :  { %p2244_p1 = pnand %p2243_p0, %p2237_p11 }
  0x22   :  { %2247 = shalt.err (!%p2244_p1)
}
  0x23   :  { %36 = dma.hbm_to_vmem [thread:$0]  %s2907_s2, 1024, %s2416_s20, [#allocation3], %s2346_s29, %s2346_s29, %s2347_s30  }
  0x24   :  { %s2348_s24 = smov [#allocation7]   ;;  %s2248_s28 = scalar_lea.hbm %s2910_s5, 1024 }
  0x25   :  { %s56_s25 = sshll.u32 %s2348_s24, 4  ;;  %p2249_p2 = scmp.ne.s32.totalorder %s2910_s5, %s2248_s28  ;;  %s57_s25 = int_to_ptr.vmem [resolvable:$true] %s56_s25 }
  0x26   :  { %p2252_p3 = scmp.lt.u32.totalorder %s2248_s28, %s2910_s5 }
  0x28   :  { %p2254_p4 = pnand %p2252_p3, %p2249_p2 }
  0x2a   :  { %2257 = shalt.err (!%p2254_p4)
}
  0x2b   :  { %s2258_s16 = scalar_lea.vmem %s57_s25, 1024  ;;  %p2263_p6 = scmp.lt.s32.totalorder %s57_s25, %s57_s25 }
  0x2c   :  { %p2259_p5 = scmp.ne.s32.totalorder %s57_s25, %s2258_s16  ;;  %p2264_p7 = scmp.lt.s32.totalorder %s2258_s16, %s2258_s16 }
  0x2e   :  { %p2265_p8 = por %p2264_p7, %p2263_p6 }
  0x30   :  { %p2266_p9 = pnand %p2265_p8, %p2259_p5 }
  0x32   :  { %2269 = shalt.err (!%p2266_p9)
}
  0x33   :  { %62 = dma.hbm_to_vmem [thread:$0]  %s2910_s5, 1024, %s57_s25, [#allocation6], %s2346_s29, %s2346_s29, %s2347_s30  }
  0x34   :  { %2336 = dma.done.wait [#allocation3], 1024  }
  0x35   :  { %2337 = vsyncadd [#allocation3], 4294966272 }
  0x36   :  { %2338 = dma.done.wait [#allocation6], 2048  }
  0x37   :  { %2339 = vsyncadd [#allocation6], 4294965248  ;;  %v2349_v0 = vmov 0.0   ;;  %v2350_v1 = vmov 0   ;;  %v79_v2 = vld [vmem:[%s2905_s0 + $0x8] sm:$0xff]  ;;  %v81_v3 = vld [vmem:[%s2905_s0 + $0x18] sm:$0xff] }
  0x38   :  { %171 = vmatprep.mubr.f32.mxu0 %v2349_v0  ;;  %2170 = vset.pattern.permute.xlu0 %v2350_v1  ;;  %v78_v4 = vld [vmem:[%s2905_s0] sm:$0xff]  ;;  %v2058_v5 = vpack.c.bf16 %v81_v3, %v79_v2  ;;  %v80_v6 = vld [vmem:[%s2905_s0 + $0x10] sm:$0xff]  ;;  %v83_v7 = vld [vmem:[%s2905_s0 + $0x28] sm:$0xff]  ;;  %vm100_vm0 = vcmask 261120   ;;  %vm198_vm1 = vcmask 130048  }
  0x39   :  { %269 = vmatprep.mubr.f32.mxu1 %v2349_v0  ;;  %2171 = vset.pattern.permute.xlu1 %v2350_v1  ;;  %v85_v8 = vld [vmem:[%s2905_s0 + $0x38] sm:$0xff]  ;;  %v2060_v9 = vpack.c.bf16 %v80_v6, %v78_v4  ;;  %v82_v11 = vld [vmem:[%s2905_s0 + $0x20] sm:$0xff]  ;;  %v84_v12 = vld [vmem:[%s2905_s0 + $0x30] sm:$0xff] }
  0x3a   :  { %v2062_v10 = vpack.c.bf16 %v85_v8, %v83_v7  ;;  %2059 = vmatprep.subr.bf16.mxu0 %v2058_v5  ;;  %v88_v13 = vld [vmem:[%s2909_s4] sm:$0xff]  ;;  %v2064_v14 = vpack.c.bf16 %v84_v12, %v82_v11  ;;  %v89_v15 = vld [vmem:[%s2909_s4 + $0x8] sm:$0xff]  ;;  %v292_v17 = vld [vmem:[%s2913_s8 + $0x10] sm:$0xff] }
  0x3b   :  { %2061 = vmatpush1.bf16.msra.mxu0 %v2060_v9  ;;  %92 = vperm.xlu0 %2170, %v88_v13   ;;  %v86_v16 = vld [vmem:[#allocation2] sm:$0xff]  ;;  %v87_v18 = vld [vmem:[#allocation2 + $0x8] sm:$0xff]  ;;  %v1964_v20 = vld [vmem:[%s2909_s4 + $0x10] sm:$0xff] }
  0x3c   :  { %2063 = vmatprep.subr.bf16.mxu0 %v2062_v10  ;;  %v290_v19 = vld [vmem:[%s2913_s8] sm:$0xff]  ;;  %v1970_v21 = vld [vmem:[%s2911_s6 + $0x10] sm:$0xff]  ;;  %v187_v33 = vld [vmem:[%s2911_s6 + $0x8] sm:$0xff] }
  0x3d   :  { %v1980_v22 = vld [vmem:[%s2913_s8 + $0x30] sm:$0xff]  ;;  %v1978_v23 = vld [vmem:[%s2913_s8 + $0x20] sm:$0xff]  ;;  %v293_v34 = vld [vmem:[%s2913_s8 + $0x18] sm:$0xff] }
  0x3e   :  { %v1998_v24 = vld [vmem:[%s2909_s4 + $0x20] sm:$0xff]  ;;  %v2014_v26 = vld [vmem:[%s2913_s8 + $0x50] sm:$0xff]  ;;  %v291_v35 = vld [vmem:[%s2913_s8 + $0x8] sm:$0xff] }
  0x3f   :  { %2065 = vmatpush1.bf16.msra.mxu0 %v2064_v14  ;;  %97 = vperm.xlu0 %2170, %v89_v15   ;;  %v2004_v25 = vld [vmem:[%s2911_s6 + $0x20] sm:$0xff]  ;;  %v2032_v28 = vld [vmem:[%s2909_s4 + $0x30] sm:$0xff]  ;;  %v1965_v36 = vld [vmem:[%s2909_s4 + $0x18] sm:$0xff] }
  0x40   :  { %v2012_v27 = vld [vmem:[%s2913_s8 + $0x40] sm:$0xff]  ;;  %v2038_v29 = vld [vmem:[%s2911_s6 + $0x30] sm:$0xff]  ;;  %v1971_v37 = vld [vmem:[%s2911_s6 + $0x18] sm:$0xff] }
  0x41   :  { %v2048_v30 = vld [vmem:[%s2913_s8 + $0x70] sm:$0xff]  ;;  %v2046_v31 = vld [vmem:[%s2913_s8 + $0x60] sm:$0xff]  ;;  %v1981_v38 = vld [vmem:[%s2913_s8 + $0x38] sm:$0xff] }
  0x42   :  { %1948 = vmatmul.mubr.msk.f32.vlgmr.msra.gmra.mrb[0].mxu0 %vm100_vm0, %v86_v16  ;;  %v186_v32 = vld [vmem:[%s2911_s6] sm:$0xff]  ;;  %v1979_v39 = vld [vmem:[%s2913_s8 + $0x28] sm:$0xff]  ;;  %v2015_v42 = vld [vmem:[%s2913_s8 + $0x58] sm:$0xff] }
  0x43   :  { %177 = vmatprep.mubr.f32.mxu0 %v2349_v0  ;;  %306 = vperm.xlu0 %2170, %v292_v17   ;;  %v1999_v40 = vld [vmem:[%s2909_s4 + $0x28] sm:$0xff]  ;;  %v2033_v44 = vld [vmem:[%s2909_s4 + $0x38] sm:$0xff]  ;;  %v184_v60 = vld [vmem:[#allocation7] sm:$0xff] }
  0x44   :  { %190 = vperm.xlu1 %2171, %v186_v32   ;;  %v2005_v41 = vld [vmem:[%s2911_s6 + $0x28] sm:$0xff]  ;;  %v2039_v45 = vld [vmem:[%s2911_s6 + $0x38] sm:$0xff] }
  0x45   :  { %v2013_v43 = vld [vmem:[%s2913_s8 + $0x48] sm:$0xff]  ;;  %v2049_v46 = vld [vmem:[%s2913_s8 + $0x78] sm:$0xff] }
  0x46   :  { %1949 = vmatmul.mubr.msk.f32.gmra.mrb[2].mxu0 %vm100_vm0, %v87_v18  ;;  %v2047_v47 = vld [vmem:[%s2913_s8 + $0x68] sm:$0xff]  ;;  %v1959_v12 = vld [vmem:[%s2905_s0 + $0x58] sm:$0xff]  ;;  %v1956_v18 = vld [vmem:[%s2905_s0 + $0x40] sm:$0xff] }
  0x47   :  { %296 = vperm.xlu0 %2170, %v290_v19   ;;  %640 = vmatprep.mubr.f32.mxu0 %v2349_v0  ;;  %v185_v61 = vld [vmem:[#allocation7 + $0x8] sm:$0xff]  ;;  %v1958_v19 = vld [vmem:[%s2905_s0 + $0x50] sm:$0xff]  ;;  %v470_v32 = vld [vmem:[#allocation2 + $0x18] sm:$0xff] }
  0x48   :  { %195 = vperm.xlu1 %2171, %v187_v33   ;;  %v1957_v11 = vld [vmem:[%s2905_s0 + $0x48] sm:$0xff] }
  0x49   :  { %v2074_v17 = vpack.c.bf16 %v1959_v12, %v1957_v11 }
  0x4b   :  { %476 = vperm.xlu0 %2170, %v1964_v20   ;;  %v1961_v20 = vld [vmem:[%s2905_s0 + $0x68] sm:$0xff] }
  0x4c   :  { %311 = vperm.xlu1 %2171, %v293_v34  }
  0x4f   :  { %665 = vperm.xlu0 %2170, %v1970_v21   ;;  %v1963_v21 = vld [vmem:[%s2905_s0 + $0x78] sm:$0xff] }
  0x50   :  { %301 = vperm.xlu1 %2171, %v291_v35  }
  0x53   :  { %782 = vperm.xlu0 %2170, %v1980_v22   ;;  %v286_v22 = vld [vmem:[%s2912_s7] sm:$0xff] }
  0x54   :  { %481 = vperm.xlu1 %2171, %v1965_v36  }
  0x57   :  { %772 = vperm.xlu0 %2170, %v1978_v23   ;;  %v2076_v23 = vpack.c.bf16 %v1958_v19, %v1956_v18  ;;  %v438_v19 = vld [vmem:[%s2906_s1 + $0x18] sm:$0xff] }
  0x58   :  { %670 = vperm.xlu1 %2171, %v1971_v37  }
  0x5b   :  { %956 = vperm.xlu0 %2170, %v1998_v24   ;;  %v2078_v24 = vpack.c.bf16 %v1963_v21, %v1961_v20 }
  0x5c   :  { %787 = vperm.xlu1 %2171, %v1981_v38  }
  0x5f   :  { %1145 = vperm.xlu0 %2170, %v2004_v25   ;;  %v1960_v25 = vld [vmem:[%s2905_s0 + $0x60] sm:$0xff] }
  0x60   :  { %777 = vperm.xlu1 %2171, %v1979_v39  }
  0x63   :  { %1262 = vperm.xlu0 %2170, %v2014_v26   ;;  %v1962_v26 = vld [vmem:[%s2905_s0 + $0x70] sm:$0xff] }
  0x64   :  { %961 = vperm.xlu1 %2171, %v1999_v40  }
  0x67   :  { %1252 = vperm.xlu0 %2170, %v2012_v27   ;;  %v287_v27 = vld [vmem:[%s2912_s7 + $0x8] sm:$0xff] }
  0x68   :  { %1150 = vperm.xlu1 %2171, %v2005_v41  }
  0x6b   :  { %1436 = vperm.xlu0 %2170, %v2032_v28   ;;  %v2080_v28 = vpack.c.bf16 %v1962_v26, %v1960_v25 }
  0x6c   :  { %1267 = vperm.xlu1 %2171, %v2015_v42  }
  0x6f   :  { %1625 = vperm.xlu0 %2170, %v2038_v29   ;;  %v288_v29 = vld [vmem:[%s2912_s7 + $0x10] sm:$0xff] }
  0x70   :  { %1257 = vperm.xlu1 %2171, %v2013_v43  }
  0x73   :  { %1742 = vperm.xlu0 %2170, %v2048_v30   ;;  %v289_v30 = vld [vmem:[%s2912_s7 + $0x18] sm:$0xff] }
  0x74   :  { %1441 = vperm.xlu1 %2171, %v2033_v44  }
  0x77   :  { %1732 = vperm.xlu0 %2170, %v2046_v31   ;;  %v469_v31 = vld [vmem:[#allocation2 + $0x10] sm:$0xff] }
  0x78   :  { %1630 = vperm.xlu1 %2171, %v2039_v45  }
  0x7c   :  { %1747 = vperm.xlu1 %2171, %v2049_v46  }
  0x80   :  { %1737 = vperm.xlu1 %2171, %v2047_v47  }
  0xba   :  { %v93_v48 = vpop.permute.xlu0 %92 }
  0xbe   :  { %v98_v51 = vpop.permute.xlu0 %97 }
  0xc2   :  { %v307_v33 = vpop.permute.xlu0 %306 }
  0xc3   :  { %v191_v62 = vpop.permute.xlu1 %190 }
  0xc6   :  { %v297_v35 = vpop.permute.xlu0 %296 }
  0xc7   :  { %v196_v3 = vpop.permute.xlu1 %195 }
  0xcb   :  { %v312_v34 = vpop.permute.xlu1 %311 }
  0xcf   :  { %v302_v41 = vpop.permute.xlu1 %301 }
 0x115   :  { %v173_v49 = vpop.f32.mrb[0].mxu0 }
 0x116   :  { %v175_v50 = vpop.f32.mrb[1].mxu0  ;;  %v174_v53 = vadd.f32 %v173_v49, %v93_v48 }
 0x117   :  { %v176_v56 = vadd.f32 %v175_v50, %v93_v48 }
 0x119   :  { %v179_v52 = vpop.f32.mrb[2].mxu0 }
 0x11a   :  { %v180_v54 = vadd.f32 %v179_v52, %v98_v51  ;;  %v181_v55 = vpop.f32.mrb[3].mxu0 }
 0x11b   :  { %v182_v57 = vadd.f32 %v181_v55, %v98_v51 }
 0x11c   :  { %v2068_v58 = vpack.c.bf16 %v180_v54, %v174_v53 }
 0x11d   :  { %v2066_v59 = vpack.c.bf16 %v182_v57, %v176_v56 }
 0x11f   :  { %2067 = vmatprep.subr.bf16.mxu1 %v2066_v59 }
 0x120   :  { %2069 = vmatpush1.bf16.msra.mxu1 %v2068_v58 }
 0x123   :  { %1950 = vmatmul.mubr.msk.f32.vlgmr.msra.gmra.mrb[0].mxu1 %vm198_vm1, %v184_v60 }
 0x124   :  { %275 = vmatprep.mubr.f32.mxu1 %v2349_v0 }
 0x127   :  { %1951 = vmatmul.mubr.msk.f32.gmra.mrb[2].mxu1 %vm198_vm1, %v185_v61 }
 0x128   :  { %390 = vmatprep.mubr.f32.mxu1 %v2349_v0 }
 0x1f6   :  { %v271_v63 = vpop.f32.mrb[0].mxu1 }
 0x1f7   :  { %v273_v1 = vpop.f32.mrb[1].mxu1  ;;  %v272_v2 = vadd.f32 %v271_v63, %v191_v62 }
 0x1f8   :  { %v274_v4 = vadd.f32 %v273_v1, %v191_v62 }
 0x1f9   :  { %v282_v9 = vmax.f32 %v272_v2, 0.0 }
 0x1fa   :  { %v277_v5 = vpop.f32.mrb[2].mxu1  ;;  %v283_v13 = vmax.f32 %v274_v4, 0.0 }
 0x1fb   :  { %v278_v6 = vadd.f32 %v277_v5, %v196_v3  ;;  %v279_v7 = vpop.f32.mrb[3].mxu1 }
 0x1fc   :  { %v280_v8 = vadd.f32 %v279_v7, %v196_v3  ;;  %v435_v7 = vld [vmem:[%s2906_s1] sm:$0xff] }
 0x1fd   :  { %v284_v10 = vmax.f32 %v278_v6, 0.0 }
 0x1fe   :  { %v285_v14 = vmax.f32 %v280_v8, 0.0 }
 0x1ff   :  { %v2072_v15 = vpack.c.bf16 %v284_v10, %v282_v9  ;;  %v436_v10 = vld [vmem:[%s2906_s1 + $0x8] sm:$0xff] }
 0x200   :  { %v2070_v16 = vpack.c.bf16 %v285_v14, %v283_v13 }
 0x202   :  { %2071 = vmatprep.subr.bf16.mxu1 %v2070_v16 }
 0x203   :  { %2073 = vmatpush1.bf16.msra.mxu1 %v2072_v15  ;;  %v437_v15 = vld [vmem:[%s2906_s1 + $0x10] sm:$0xff] }
 0x204   :  { %2075 = vmatprep.subr.bf16.mxu1 %v2074_v17 }
 0x206   :  { %1952 = vmatmul.mubr.msk.f32.vlgmr.msra.gmra.mrb[4].mxu1 %vm198_vm1, %v286_v22 }
 0x207   :  { %396 = vmatprep.mubr.f32.mxu1 %v2349_v0  ;;  %2077 = vmatpush1.bf16.msra.mxu1 %v2076_v23 }
 0x208   :  { %2079 = vmatprep.subr.bf16.mxu1 %v2078_v24 }
 0x20a   :  { %1953 = vmatmul.mubr.msk.f32.gmra.mrb[6].mxu1 %vm198_vm1, %v287_v27 }
 0x20b   :  { %402 = vmatprep.mubr.f32.mxu1 %v2349_v0  ;;  %2081 = vmatpush1.bf16.msra.mxu1 %v2080_v28  ;;  %v568_v28 = vld [vmem:[#allocation5 + $0x10] sm:$0xff] }
 0x20e   :  { %1954 = vmatmul.mubr.msk.f32.gmra.mrb[8].mxu1 %vm198_vm1, %v288_v29  ;;  %v569_v29 = vld [vmem:[#allocation5 + $0x18] sm:$0xff] }
 0x20f   :  { %408 = vmatprep.mubr.f32.mxu1 %v2349_v0 }
 0x212   :  { %1955 = vmatmul.mubr.msk.f32.gmra.mrb[10].mxu1 %vm198_vm1, %v289_v30  ;;  %v477_v30 = vpop.permute.xlu0 %476 }
 0x213   :  { %554 = vmatprep.mubr.f32.mxu1 %v2349_v0 }
 0x216   :  { %1966 = vmatmul.mubr.msk.f32.vlgmr.msra.gmra.mrb[12].mxu1 %vm100_vm0, %v469_v31 }
 0x217   :  { %560 = vmatprep.mubr.f32.mxu1 %v2349_v0 }
 0x21a   :  { %1967 = vmatmul.mubr.msk.f32.gmra.mrb[14].mxu1 %vm100_vm0, %v470_v32 }
 0x21b   :  { %743 = vmatprep.mubr.f32.mxu1 %v2349_v0 }
 0x2d9   :  { %v392_v36 = vpop.f32.mrb[4].mxu1 }
 0x2da   :  { %v393_v37 = vadd.f32 %v392_v36, %v297_v35  ;;  %v394_v38 = vpop.f32.mrb[5].mxu1  ;;  %v482_v36 = vpop.permute.xlu1 %481 }
 0x2db   :  { %v395_v39 = vadd.f32 %v394_v38, %v297_v35 }
 0x2dc   :  { %v415_v40 = vmin.f32 %v393_v37, 10.0 }
 0x2dd   :  { %v416_v42 = vmin.f32 %v395_v39, 10.0  ;;  %v398_v43 = vpop.f32.mrb[6].mxu1 }
 0x2de   :  { %451 = vst [vmem:[#allocation9] sm:$0xff] %v415_v40  ;;  %v399_v44 = vadd.f32 %v398_v43, %v302_v41  ;;  %v400_v45 = vpop.f32.mrb[7].mxu1 }
 0x2df   :  { %452 = vst [vmem:[#allocation9 + $0x8] sm:$0xff] %v416_v42  ;;  %v401_v46 = vadd.f32 %v400_v45, %v302_v41 }
 0x2e0   :  { %v417_v47 = vmin.f32 %v399_v44, 10.0 }
 0x2e1   :  { %v418_v48 = vmin.f32 %v401_v46, 10.0  ;;  %v404_v49 = vpop.f32.mrb[8].mxu1  ;;  %v658_v46 = vld [vmem:[#allocation7 + $0x10] sm:$0xff] }
 0x2e2   :  { %453 = vst [vmem:[#allocation9 + $0x10] sm:$0xff] %v417_v47  ;;  %v405_v50 = vadd.f32 %v404_v49, %v307_v33  ;;  %v406_v51 = vpop.f32.mrb[9].mxu1 }
 0x2e3   :  { %454 = vst [vmem:[#allocation9 + $0x18] sm:$0xff] %v418_v48  ;;  %v407_v52 = vadd.f32 %v406_v51, %v307_v33 }
 0x2e4   :  { %v419_v53 = vmin.f32 %v405_v50, 10.0  ;;  %v666_v50 = vpop.permute.xlu0 %665 }
 0x2e5   :  { %v420_v54 = vmin.f32 %v407_v52, 10.0  ;;  %v410_v55 = vpop.f32.mrb[10].mxu1  ;;  %v671_v52 = vpop.permute.xlu1 %670 }
 0x2e6   :  { %v423_v56 = vmul.f32 1.442695, %v419_v53  ;;  %v411_v57 = vadd.f32 %v410_v55, %v312_v34  ;;  %v412_v58 = vpop.f32.mrb[11].mxu1 }
 0x2e7   :  { %v425_v59 = vmul.f32 1.442695, %v420_v54  ;;  %v413_v60 = vadd.f32 %v412_v58, %v312_v34 }
 0x2e8   :  { %2172 = vpow2.f32 %v423_v56  ;;  %v421_v61 = vmin.f32 %v411_v57, 10.0 }
 0x2e9   :  { %2174 = vpow2.f32 %v425_v59  ;;  %v422_v62 = vmin.f32 %v413_v60, 10.0  ;;  %v556_v63 = vpop.f32.mrb[12].mxu1 }
 0x2ea   :  { %v427_v1 = vmul.f32 1.442695, %v421_v61  ;;  %v558_v2 = vpop.f32.mrb[13].mxu1  ;;  %v557_v31 = vadd.f32 %v556_v63, %v477_v30 }
 0x2eb   :  { %v429_v3 = vmul.f32 1.442695, %v422_v62  ;;  %v559_v32 = vadd.f32 %v558_v2, %v477_v30  ;;  %v1975_v2 = vld [vmem:[%s2912_s7 + $0x28] sm:$0xff] }
 0x2ec   :  { %2176 = vpow2.f32 %v427_v1  ;;  %v1974_v1 = vld [vmem:[%s2912_s7 + $0x20] sm:$0xff] }
 0x2ed   :  { %2178 = vpow2.f32 %v429_v3  ;;  %v562_v4 = vpop.f32.mrb[14].mxu1  ;;  %v1976_v3 = vld [vmem:[%s2912_s7 + $0x30] sm:$0xff] }
 0x2ee   :  { %v564_v5 = vpop.f32.mrb[15].mxu1  ;;  %v563_v38 = vadd.f32 %v562_v4, %v482_v36  ;;  %v1977_v4 = vld [vmem:[%s2912_s7 + $0x38] sm:$0xff] }
 0x2ef   :  { %v565_v39 = vadd.f32 %v564_v5, %v482_v36  ;;  %v1991_v5 = vld [vmem:[%s2905_s0 + $0x88] sm:$0xff] }
 0x2f2   :  { %v2173_v6 = vpop.eup %2172 }
 0x2f3   :  { %v2175_v8 = vpop.eup %2174  ;;  %v431_v9 = vadd.f32 0.001, %v2173_v6  ;;  %v1993_v6 = vld [vmem:[%s2905_s0 + $0x98] sm:$0xff] }
 0x2f4   :  { %v432_v11 = vadd.f32 0.001, %v2175_v8  ;;  %v1990_v8 = vld [vmem:[%s2905_s0 + $0x80] sm:$0xff] }
 0x2f5   :  { %v439_v12 = vmul.f32 %v435_v7, %v431_v9  ;;  %455 = vst [vmem:[#allocation11] sm:$0xff] %v431_v9  ;;  %v2094_v7 = vpack.c.bf16 %v1993_v6, %v1991_v5  ;;  %v1992_v9 = vld [vmem:[%s2905_s0 + $0x90] sm:$0xff] }
 0x2f6   :  { %v2177_v13 = vpop.eup %2176  ;;  %v440_v14 = vmul.f32 %v436_v10, %v432_v11  ;;  %456 = vst [vmem:[#allocation11 + $0x8] sm:$0xff] %v432_v11  ;;  %v2096_v10 = vpack.c.bf16 %v1992_v9, %v1990_v8  ;;  %v1995_v11 = vld [vmem:[%s2905_s0 + $0xa8] sm:$0xff] }
 0x2f7   :  { %v2179_v16 = vpop.eup %2178  ;;  %v443_v17 = vadd.f32 %v439_v12, %v415_v40  ;;  %v433_v18 = vadd.f32 0.001, %v2177_v13  ;;  %v1997_v12 = vld [vmem:[%s2905_s0 + $0xb8] sm:$0xff] }
 0x2f8   :  { %v434_v20 = vadd.f32 0.001, %v2179_v16  ;;  %v444_v21 = vadd.f32 %v440_v14, %v416_v42  ;;  %v2098_v13 = vpack.c.bf16 %v1997_v12, %v1995_v11  ;;  %v1994_v14 = vld [vmem:[%s2905_s0 + $0xa0] sm:$0xff]  ;;  %v1049_v11 = vld [vmem:[#allocation5 + $0x28] sm:$0xff] }
 0x2f9   :  { %447 = vst [vmem:[#allocation8] sm:$0xff] %v443_v17  ;;  %v441_v22 = vmul.f32 %v437_v15, %v433_v18  ;;  %457 = vst [vmem:[#allocation11 + $0x10] sm:$0xff] %v433_v18  ;;  %v1996_v15 = vld [vmem:[%s2905_s0 + $0xb0] sm:$0xff]  ;;  %v950_v18 = vld [vmem:[#allocation2 + $0x28] sm:$0xff] }
 0x2fa   :  { %v442_v23 = vmul.f32 %v438_v19, %v434_v20  ;;  %458 = vst [vmem:[#allocation11 + $0x18] sm:$0xff] %v434_v20  ;;  %448 = vst [vmem:[#allocation8 + $0x8] sm:$0xff] %v444_v21  ;;  %v2100_v16 = vpack.c.bf16 %v1996_v15, %v1994_v14  ;;  %v783_v19 = vpop.permute.xlu0 %782  ;;  %v788_v20 = vpop.permute.xlu1 %787 }
 0x2fb   :  { %v445_v24 = vadd.f32 %v441_v22, %v417_v47  ;;  %v659_v47 = vld [vmem:[#allocation7 + $0x18] sm:$0xff] }
 0x2fc   :  { %v446_v25 = vadd.f32 %v442_v23, %v418_v48 }
 0x2fd   :  { %449 = vst [vmem:[#allocation8 + $0x10] sm:$0xff] %v445_v24  ;;  %v2084_v26 = vpack.c.bf16 %v445_v24, %v443_v17  ;;  %v949_v17 = vld [vmem:[#allocation2 + $0x20] sm:$0xff] }
 0x2fe   :  { %450 = vst [vmem:[#allocation8 + $0x18] sm:$0xff] %v446_v25  ;;  %v2082_v27 = vpack.c.bf16 %v446_v25, %v444_v21  ;;  %v773_v21 = vpop.permute.xlu0 %772 }
 0x300   :  { %2083 = vmatprep.subr.bf16.mxu0 %v2082_v27  ;;  %v778_v27 = vpop.permute.xlu1 %777 }
 0x301   :  { %2085 = vmatpush1.bf16.msra.mxu0 %v2084_v26 }
 0x302   :  { %v957_v14 = vpop.permute.xlu0 %956 }
 0x304   :  { %1968 = vmatmul.mubr.msk.f32.vlgmr.msra.gmra.mrb[4].mxu0 %vm198_vm1, %v568_v28  ;;  %v962_v15 = vpop.permute.xlu1 %961 }
 0x305   :  { %646 = vmatprep.mubr.f32.mxu0 %v2349_v0 }
 0x308   :  { %1969 = vmatmul.mubr.msk.f32.gmra.mrb[6].mxu0 %vm198_vm1, %v569_v29 }
 0x309   :  { %866 = vmatprep.mubr.f32.mxu0 %v2349_v0 }
 0x3d7   :  { %v642_v33 = vpop.f32.mrb[4].mxu0 }
 0x3d8   :  { %v653_v34 = vadd.f32 %v642_v33, %v557_v31  ;;  %v644_v35 = vpop.f32.mrb[5].mxu0 }
 0x3d9   :  { %v654_v37 = vadd.f32 %v644_v35, %v559_v32 }
 0x3db   :  { %v648_v40 = vpop.f32.mrb[6].mxu0 }
 0x3dc   :  { %v655_v41 = vadd.f32 %v648_v40, %v563_v38  ;;  %v650_v42 = vpop.f32.mrb[7].mxu0 }
 0x3dd   :  { %v656_v43 = vadd.f32 %v650_v42, %v565_v39 }
 0x3de   :  { %v2088_v44 = vpack.c.bf16 %v655_v41, %v653_v34 }
 0x3df   :  { %v2086_v45 = vpack.c.bf16 %v656_v43, %v654_v37 }
 0x3e1   :  { %2087 = vmatprep.subr.bf16.mxu1 %v2086_v45 }
 0x3e2   :  { %2089 = vmatpush1.bf16.msra.mxu1 %v2088_v44 }
 0x3e3   :  { %2095 = vmatprep.subr.bf16.mxu1 %v2094_v7 }
 0x3e5   :  { %1972 = vmatmul.mubr.msk.f32.vlgmr.msra.gmra.mrb[16].mxu1 %vm198_vm1, %v658_v46 }
 0x3e6   :  { %749 = vmatprep.mubr.f32.mxu1 %v2349_v0  ;;  %2097 = vmatpush1.bf16.msra.mxu1 %v2096_v10  ;;  %v1048_v10 = vld [vmem:[#allocation5 + $0x20] sm:$0xff] }
 0x3e7   :  { %2099 = vmatprep.subr.bf16.mxu1 %v2098_v13 }
 0x3e9   :  { %1973 = vmatmul.mubr.msk.f32.gmra.mrb[18].mxu1 %vm198_vm1, %v659_v47 }
 0x3ea   :  { %1034 = vmatprep.mubr.f32.mxu1 %v2349_v0  ;;  %2101 = vmatpush1.bf16.msra.mxu1 %v2100_v16 }
 0x3ed   :  { %2000 = vmatmul.mubr.msk.f32.vlgmr.msra.gmra.mrb[20].mxu1 %vm100_vm0, %v949_v17 }
 0x3ee   :  { %1040 = vmatprep.mubr.f32.mxu1 %v2349_v0 }
 0x3f1   :  { %2001 = vmatmul.mubr.msk.f32.gmra.mrb[22].mxu1 %vm100_vm0, %v950_v18 }
 0x3f2   :  { %1120 = vmatprep.mubr.f32.mxu1 %v2349_v0 }
 0x4b8   :  { %v745_v48 = vpop.f32.mrb[16].mxu1 }
 0x4b9   :  { %v747_v49 = vpop.f32.mrb[17].mxu1  ;;  %v746_v51 = vadd.f32 %v745_v48, %v666_v50 }
 0x4ba   :  { %v748_v53 = vadd.f32 %v747_v49, %v666_v50 }
 0x4bb   :  { %v756_v58 = vmax.f32 %v746_v51, 0.0 }
 0x4bc   :  { %v751_v54 = vpop.f32.mrb[18].mxu1  ;;  %v757_v60 = vmax.f32 %v748_v53, 0.0 }
 0x4bd   :  { %v752_v55 = vadd.f32 %v751_v54, %v671_v52  ;;  %v753_v56 = vpop.f32.mrb[19].mxu1 }
 0x4be   :  { %v754_v57 = vadd.f32 %v753_v56, %v671_v52  ;;  %v1986_v52 = vld [vmem:[%s2906_s1 + $0x20] sm:$0xff] }
 0x4bf   :  { %v758_v59 = vmax.f32 %v752_v55, 0.0  ;;  %v1987_v55 = vld [vmem:[%s2906_s1 + $0x28] sm:$0xff] }
 0x4c0   :  { %v759_v61 = vmax.f32 %v754_v57, 0.0 }
 0x4c1   :  { %v2092_v62 = vpack.c.bf16 %v758_v59, %v756_v58 }
 0x4c2   :  { %v2090_v63 = vpack.c.bf16 %v759_v61, %v757_v60  ;;  %v1988_v60 = vld [vmem:[%s2906_s1 + $0x30] sm:$0xff] }
 0x4c4   :  { %2091 = vmatprep.subr.bf16.mxu0 %v2090_v63 }
 0x4c5   :  { %2093 = vmatpush1.bf16.msra.mxu0 %v2092_v62 }
 0x4c8   :  { %1982 = vmatmul.mubr.msk.f32.vlgmr.msra.gmra.mrb[8].mxu0 %vm198_vm1, %v1974_v1  ;;  %v1989_v1 = vld [vmem:[%s2906_s1 + $0x38] sm:$0xff] }
 0x4c9   :  { %872 = vmatprep.mubr.f32.mxu0 %v2349_v0 }
 0x4cc   :  { %1983 = vmatmul.mubr.msk.f32.gmra.mrb[10].mxu0 %vm198_vm1, %v1975_v2 }
 0x4cd   :  { %878 = vmatprep.mubr.f32.mxu0 %v2349_v0 }
 0x4d0   :  { %1984 = vmatmul.mubr.msk.f32.gmra.mrb[12].mxu0 %vm198_vm1, %v1976_v3 }
 0x4d1   :  { %884 = vmatprep.mubr.f32.mxu0 %v2349_v0 }
 0x4d4   :  { %1985 = vmatmul.mubr.msk.f32.gmra.mrb[14].mxu0 %vm198_vm1, %v1977_v4 }
 0x4d5   :  { %1223 = vmatprep.mubr.f32.mxu0 %v2349_v0 }
 0x59b   :  { %v868_v22 = vpop.f32.mrb[8].mxu0 }
 0x59c   :  { %v869_v23 = vadd.f32 %v868_v22, %v773_v21  ;;  %v870_v24 = vpop.f32.mrb[9].mxu0 }
 0x59d   :  { %v871_v25 = vadd.f32 %v870_v24, %v773_v21  ;;  %v1138_v24 = vld [vmem:[#allocation7 + $0x20] sm:$0xff] }
 0x59e   :  { %v891_v26 = vmin.f32 %v869_v23, 10.0 }
 0x59f   :  { %v892_v28 = vmin.f32 %v871_v25, 10.0  ;;  %v874_v29 = vpop.f32.mrb[10].mxu0  ;;  %v1139_v25 = vld [vmem:[#allocation7 + $0x28] sm:$0xff] }
 0x5a0   :  { %930 = vst [vmem:[#allocation9 + $0x20] sm:$0xff] %v891_v26  ;;  %v875_v30 = vadd.f32 %v874_v29, %v778_v27  ;;  %v876_v31 = vpop.f32.mrb[11].mxu0 }
 0x5a1   :  { %931 = vst [vmem:[#allocation9 + $0x28] sm:$0xff] %v892_v28  ;;  %v877_v32 = vadd.f32 %v876_v31, %v778_v27 }
 0x5a2   :  { %v893_v33 = vmin.f32 %v875_v30, 10.0  ;;  %v1151_v30 = vpop.permute.xlu1 %1150 }
 0x5a3   :  { %v894_v34 = vmin.f32 %v877_v32, 10.0  ;;  %v880_v35 = vpop.f32.mrb[12].mxu0 }
 0x5a4   :  { %932 = vst [vmem:[#allocation9 + $0x30] sm:$0xff] %v893_v33  ;;  %v881_v36 = vadd.f32 %v880_v35, %v783_v19  ;;  %v882_v37 = vpop.f32.mrb[13].mxu0 }
 0x5a5   :  { %933 = vst [vmem:[#allocation9 + $0x38] sm:$0xff] %v894_v34  ;;  %v883_v38 = vadd.f32 %v882_v37, %v783_v19 }
 0x5a6   :  { %v895_v39 = vmin.f32 %v881_v36, 10.0 }
 0x5a7   :  { %v896_v40 = vmin.f32 %v883_v38, 10.0  ;;  %v886_v41 = vpop.f32.mrb[14].mxu0 }
 0x5a8   :  { %v899_v42 = vmul.f32 1.442695, %v895_v39  ;;  %v887_v43 = vadd.f32 %v886_v41, %v788_v20  ;;  %v888_v44 = vpop.f32.mrb[15].mxu0 }
 0x5a9   :  { %v901_v45 = vmul.f32 1.442695, %v896_v40  ;;  %v889_v46 = vadd.f32 %v888_v44, %v788_v20  ;;  %v2010_v44 = vld [vmem:[%s2912_s7 + $0x50] sm:$0xff] }
 0x5aa   :  { %2180 = vpow2.f32 %v899_v42  ;;  %v897_v47 = vmin.f32 %v887_v43, 10.0  ;;  %v2008_v42 = vld [vmem:[%s2912_s7 + $0x40] sm:$0xff]  ;;  %v2009_v43 = vld [vmem:[%s2912_s7 + $0x48] sm:$0xff] }
 0x5ab   :  { %2182 = vpow2.f32 %v901_v45  ;;  %v898_v48 = vmin.f32 %v889_v46, 10.0  ;;  %v2011_v45 = vld [vmem:[%s2912_s7 + $0x58] sm:$0xff]  ;;  %v2025_v46 = vld [vmem:[%s2905_s0 + $0xc8] sm:$0xff] }
 0x5ac   :  { %v903_v49 = vmul.f32 1.442695, %v897_v47  ;;  %v2027_v47 = vld [vmem:[%s2905_s0 + $0xd8] sm:$0xff] }
 0x5ad   :  { %v905_v50 = vmul.f32 1.442695, %v898_v48  ;;  %v2114_v48 = vpack.c.bf16 %v2027_v47, %v2025_v46 }
 0x5ae   :  { %2184 = vpow2.f32 %v903_v49  ;;  %v2024_v49 = vld [vmem:[%s2905_s0 + $0xc0] sm:$0xff] }
 0x5af   :  { %2186 = vpow2.f32 %v905_v50  ;;  %v2026_v50 = vld [vmem:[%s2905_s0 + $0xd0] sm:$0xff] }
 0x5b4   :  { %v2181_v51 = vpop.eup %2180 }
 0x5b5   :  { %v2183_v53 = vpop.eup %2182  ;;  %v907_v54 = vadd.f32 0.001, %v2181_v51  ;;  %v2116_v51 = vpack.c.bf16 %v2026_v50, %v2024_v49 }
 0x5b6   :  { %v908_v56 = vadd.f32 0.001, %v2183_v53  ;;  %v2031_v53 = vld [vmem:[%s2905_s0 + $0xf8] sm:$0xff] }
 0x5b7   :  { %v916_v57 = vmul.f32 %v1986_v52, %v907_v54  ;;  %935 = vst [vmem:[#allocation11 + $0x20] sm:$0xff] %v907_v54  ;;  %v2029_v52 = vld [vmem:[%s2905_s0 + $0xe8] sm:$0xff] }
 0x5b8   :  { %v2185_v58 = vpop.eup %2184  ;;  %v917_v59 = vmul.f32 %v1987_v55, %v908_v56  ;;  %936 = vst [vmem:[#allocation11 + $0x28] sm:$0xff] %v908_v56  ;;  %v2118_v54 = vpack.c.bf16 %v2031_v53, %v2029_v52  ;;  %v2028_v55 = vld [vmem:[%s2905_s0 + $0xe0] sm:$0xff]  ;;  %v2030_v56 = vld [vmem:[%s2905_s0 + $0xf0] sm:$0xff]  ;;  %v1529_v52 = vld [vmem:[#allocation5 + $0x38] sm:$0xff] }
 0x5b9   :  { %v2187_v61 = vpop.eup %2186  ;;  %v920_v62 = vadd.f32 %v916_v57, %v891_v26  ;;  %v909_v63 = vadd.f32 0.001, %v2185_v58  ;;  %v2120_v57 = vpack.c.bf16 %v2030_v56, %v2028_v55  ;;  %v1429_v58 = vld [vmem:[#allocation2 + $0x30] sm:$0xff] }
 0x5ba   :  { %v910_v2 = vadd.f32 0.001, %v2187_v61  ;;  %v921_v3 = vadd.f32 %v917_v59, %v892_v28  ;;  %v1146_v28 = vpop.permute.xlu0 %1145  ;;  %v1430_v59 = vld [vmem:[#allocation2 + $0x38] sm:$0xff]  ;;  %v1268_v61 = vpop.permute.xlu1 %1267 }
 0x5bb   :  { %925 = vst [vmem:[#allocation8 + $0x20] sm:$0xff] %v920_v62  ;;  %v918_v4 = vmul.f32 %v1988_v60, %v909_v63  ;;  %937 = vst [vmem:[#allocation11 + $0x30] sm:$0xff] %v909_v63 }
 0x5bc   :  { %v919_v5 = vmul.f32 %v1989_v1, %v910_v2  ;;  %938 = vst [vmem:[#allocation11 + $0x38] sm:$0xff] %v910_v2  ;;  %926 = vst [vmem:[#allocation8 + $0x28] sm:$0xff] %v921_v3 }
 0x5bd   :  { %v922_v6 = vadd.f32 %v918_v4, %v893_v33 }
 0x5be   :  { %v923_v7 = vadd.f32 %v919_v5, %v894_v34  ;;  %v1263_v60 = vpop.permute.xlu0 %1262  ;;  %v1258_v5 = vpop.permute.xlu1 %1257 }
 0x5bf   :  { %927 = vst [vmem:[#allocation8 + $0x30] sm:$0xff] %v922_v6  ;;  %v2104_v8 = vpack.c.bf16 %v922_v6, %v920_v62 }
 0x5c0   :  { %928 = vst [vmem:[#allocation8 + $0x38] sm:$0xff] %v923_v7  ;;  %v2102_v9 = vpack.c.bf16 %v923_v7, %v921_v3 }
 0x5c2   :  { %2103 = vmatprep.subr.bf16.mxu1 %v2102_v9  ;;  %v1253_v62 = vpop.permute.xlu0 %1252  ;;  %v1442_v56 = vpop.permute.xlu1 %1441 }
 0x5c3   :  { %2105 = vmatpush1.bf16.msra.mxu1 %v2104_v8 }
 0x5c6   :  { %2002 = vmatmul.mubr.msk.f32.vlgmr.msra.gmra.mrb[20].mxu1 %vm198_vm1, %v1048_v10  ;;  %v1437_v55 = vpop.permute.xlu0 %1436 }
 0x5c7   :  { %1126 = vmatprep.mubr.f32.mxu1 %v2349_v0 }
 0x5ca   :  { %2003 = vmatmul.mubr.msk.f32.gmra.mrb[22].mxu1 %vm198_vm1, %v1049_v11 }
 0x5cb   :  { %1346 = vmatprep.mubr.f32.mxu1 %v2349_v0 }
 0x699   :  { %v1122_v12 = vpop.f32.mrb[20].mxu1 }
 0x69a   :  { %v1124_v13 = vpop.f32.mrb[21].mxu1  ;;  %v2142_v17 = vadd.f32 %v1122_v12, %v957_v14 }
 0x69b   :  { %v2143_v20 = vadd.f32 %v1124_v13, %v957_v14 }
 0x69d   :  { %v1128_v16 = vpop.f32.mrb[22].mxu1 }
 0x69e   :  { %v2144_v18 = vadd.f32 %v1128_v16, %v962_v15  ;;  %v1130_v19 = vpop.f32.mrb[23].mxu1 }
 0x69f   :  { %v2145_v21 = vadd.f32 %v1130_v19, %v962_v15 }
 0x6a0   :  { %v2108_v22 = vpack.c.bf16 %v2144_v18, %v2142_v17 }
 0x6a1   :  { %v2106_v23 = vpack.c.bf16 %v2145_v21, %v2143_v20 }
 0x6a3   :  { %2107 = vmatprep.subr.bf16.mxu0 %v2106_v23 }
 0x6a4   :  { %2109 = vmatpush1.bf16.msra.mxu0 %v2108_v22 }
 0x6a5   :  { %2115 = vmatprep.subr.bf16.mxu0 %v2114_v48 }
 0x6a7   :  { %2006 = vmatmul.mubr.msk.f32.vlgmr.msra.gmra.mrb[16].mxu0 %vm198_vm1, %v1138_v24 }
 0x6a8   :  { %1229 = vmatprep.mubr.f32.mxu0 %v2349_v0  ;;  %2117 = vmatpush1.bf16.msra.mxu0 %v2116_v51  ;;  %v1528_v51 = vld [vmem:[#allocation5 + $0x30] sm:$0xff] }
 0x6a9   :  { %2119 = vmatprep.subr.bf16.mxu0 %v2118_v54 }
 0x6ab   :  { %2007 = vmatmul.mubr.msk.f32.gmra.mrb[18].mxu0 %vm198_vm1, %v1139_v25 }
 0x6ac   :  { %1514 = vmatprep.mubr.f32.mxu0 %v2349_v0  ;;  %2121 = vmatpush1.bf16.msra.mxu0 %v2120_v57 }
 0x6af   :  { %2034 = vmatmul.mubr.msk.f32.vlgmr.msra.gmra.mrb[20].mxu0 %vm100_vm0, %v1429_v58 }
 0x6b0   :  { %1520 = vmatprep.mubr.f32.mxu0 %v2349_v0 }
 0x6b3   :  { %2035 = vmatmul.mubr.msk.f32.gmra.mrb[22].mxu0 %vm100_vm0, %v1430_v59 }
 0x6b4   :  { %1600 = vmatprep.mubr.f32.mxu0 %v2349_v0 }
 0x77a   :  { %v1225_v26 = vpop.f32.mrb[16].mxu0 }
 0x77b   :  { %v1227_v27 = vpop.f32.mrb[17].mxu0  ;;  %v1226_v29 = vadd.f32 %v1225_v26, %v1146_v28 }
 0x77c   :  { %v1228_v31 = vadd.f32 %v1227_v27, %v1146_v28 }
 0x77d   :  { %v1236_v36 = vmax.f32 %v1226_v29, 0.0 }
 0x77e   :  { %v1231_v32 = vpop.f32.mrb[18].mxu0  ;;  %v1237_v38 = vmax.f32 %v1228_v31, 0.0 }
 0x77f   :  { %v1232_v33 = vadd.f32 %v1231_v32, %v1151_v30  ;;  %v1233_v34 = vpop.f32.mrb[19].mxu0 }
 0x780   :  { %v1234_v35 = vadd.f32 %v1233_v34, %v1151_v30  ;;  %v2020_v30 = vld [vmem:[%s2906_s1 + $0x40] sm:$0xff] }
 0x781   :  { %v1238_v37 = vmax.f32 %v1232_v33, 0.0  ;;  %v2021_v33 = vld [vmem:[%s2906_s1 + $0x48] sm:$0xff] }
 0x782   :  { %v1239_v39 = vmax.f32 %v1234_v35, 0.0 }
 0x783   :  { %v2112_v40 = vpack.c.bf16 %v1238_v37, %v1236_v36 }
 0x784   :  { %v2110_v41 = vpack.c.bf16 %v1239_v39, %v1237_v38  ;;  %v2022_v38 = vld [vmem:[%s2906_s1 + $0x50] sm:$0xff] }
 0x786   :  { %2111 = vmatprep.subr.bf16.mxu1 %v2110_v41 }
 0x787   :  { %2113 = vmatpush1.bf16.msra.mxu1 %v2112_v40 }
 0x78a   :  { %2016 = vmatmul.mubr.msk.f32.vlgmr.msra.gmra.mrb[24].mxu1 %vm198_vm1, %v2008_v42  ;;  %v2023_v42 = vld [vmem:[%s2906_s1 + $0x58] sm:$0xff] }
 0x78b   :  { %1352 = vmatprep.mubr.f32.mxu1 %v2349_v0 }
 0x78e   :  { %2017 = vmatmul.mubr.msk.f32.gmra.mrb[26].mxu1 %vm198_vm1, %v2009_v43 }
 0x78f   :  { %1358 = vmatprep.mubr.f32.mxu1 %v2349_v0 }
 0x792   :  { %2018 = vmatmul.mubr.msk.f32.gmra.mrb[28].mxu1 %vm198_vm1, %v2010_v44 }
 0x793   :  { %1364 = vmatprep.mubr.f32.mxu1 %v2349_v0 }
 0x796   :  { %2019 = vmatmul.mubr.msk.f32.gmra.mrb[30].mxu1 %vm198_vm1, %v2011_v45 }
 0x797   :  { %1703 = vmatprep.mubr.f32.mxu1 %v2349_v0 }
 0x85d   :  { %v1348_v63 = vpop.f32.mrb[24].mxu1 }
 0x85e   :  { %v1349_v1 = vadd.f32 %v1348_v63, %v1253_v62  ;;  %v1350_v2 = vpop.f32.mrb[25].mxu1 }
 0x85f   :  { %v1351_v3 = vadd.f32 %v1350_v2, %v1253_v62  ;;  %v1618_v2 = vld [vmem:[#allocation7 + $0x30] sm:$0xff] }
 0x860   :  { %v1371_v4 = vmin.f32 %v1349_v1, 10.0 }
 0x861   :  { %v1372_v6 = vmin.f32 %v1351_v3, 10.0  ;;  %v1354_v7 = vpop.f32.mrb[26].mxu1  ;;  %v1619_v3 = vld [vmem:[#allocation7 + $0x38] sm:$0xff] }
 0x862   :  { %1410 = vst [vmem:[#allocation9 + $0x40] sm:$0xff] %v1371_v4  ;;  %v1355_v8 = vadd.f32 %v1354_v7, %v1258_v5  ;;  %v1356_v9 = vpop.f32.mrb[27].mxu1 }
 0x863   :  { %1411 = vst [vmem:[#allocation9 + $0x48] sm:$0xff] %v1372_v6  ;;  %v1357_v10 = vadd.f32 %v1356_v9, %v1258_v5 }
 0x864   :  { %v1373_v11 = vmin.f32 %v1355_v8, 10.0  ;;  %v1631_v8 = vpop.permute.xlu1 %1630 }
 0x865   :  { %v1374_v12 = vmin.f32 %v1357_v10, 10.0  ;;  %v1360_v13 = vpop.f32.mrb[28].mxu1 }
 0x866   :  { %1412 = vst [vmem:[#allocation9 + $0x50] sm:$0xff] %v1373_v11  ;;  %v1361_v14 = vadd.f32 %v1360_v13, %v1263_v60  ;;  %v1362_v15 = vpop.f32.mrb[29].mxu1 }
 0x867   :  { %1413 = vst [vmem:[#allocation9 + $0x58] sm:$0xff] %v1374_v12  ;;  %v1363_v16 = vadd.f32 %v1362_v15, %v1263_v60 }
 0x868   :  { %v1375_v17 = vmin.f32 %v1361_v14, 10.0 }
 0x869   :  { %v1376_v18 = vmin.f32 %v1363_v16, 10.0  ;;  %v1366_v19 = vpop.f32.mrb[30].mxu1 }
 0x86a   :  { %v1379_v20 = vmul.f32 1.442695, %v1375_v17  ;;  %v1367_v21 = vadd.f32 %v1366_v19, %v1268_v61  ;;  %v1368_v22 = vpop.f32.mrb[31].mxu1 }
 0x86b   :  { %v1381_v23 = vmul.f32 1.442695, %v1376_v18  ;;  %v1369_v24 = vadd.f32 %v1368_v22, %v1268_v61  ;;  %v2044_v22 = vld [vmem:[%s2912_s7 + $0x70] sm:$0xff] }
 0x86c   :  { %2188 = vpow2.f32 %v1379_v20  ;;  %v1377_v25 = vmin.f32 %v1367_v21, 10.0  ;;  %v2042_v20 = vld [vmem:[%s2912_s7 + $0x60] sm:$0xff]  ;;  %v2043_v21 = vld [vmem:[%s2912_s7 + $0x68] sm:$0xff] }
 0x86d   :  { %2190 = vpow2.f32 %v1381_v23  ;;  %v1378_v26 = vmin.f32 %v1369_v24, 10.0  ;;  %v2045_v23 = vld [vmem:[%s2912_s7 + $0x78] sm:$0xff]  ;;  %s2351_s7 = smov [#allocation9]  }
 0x86e   :  { %v1383_v27 = vmul.f32 1.442695, %v1377_v25  ;;  %v1748_v25 = vpop.permute.xlu1 %1747  ;;  %s1916_s28 = sshll.u32 %s2351_s7, 4  ;;  %s1917_s28 = int_to_ptr.vmem [resolvable:$true] %s1916_s28 }
 0x86f   :  { %v1385_v28 = vmul.f32 1.442695, %v1378_v26  ;;  %s2270_s12 = scalar_lea.vmem %s1917_s28, 2048  ;;  %p2275_p11 = scmp.lt.s32.totalorder %s1917_s28, %s1917_s28 }
 0x870   :  { %2192 = vpow2.f32 %v1383_v27  ;;  %p2271_p10 = scmp.ne.s32.totalorder %s1917_s28, %s2270_s12  ;;  %p2276_p12 = scmp.lt.s32.totalorder %s2270_s12, %s2270_s12 }
 0x871   :  { %2194 = vpow2.f32 %v1385_v28 }
 0x872   :  { %p2277_p13 = por %p2276_p12, %p2275_p11 }
 0x874   :  { %p2278_p0 = pnand %p2277_p13, %p2271_p10 }
 0x876   :  { %v2189_v29 = vpop.eup %2188 }
 0x877   :  { %v2191_v31 = vpop.eup %2190  ;;  %v1387_v32 = vadd.f32 0.001, %v2189_v29 }
 0x878   :  { %v1388_v34 = vadd.f32 0.001, %v2191_v31 }
 0x879   :  { %v1396_v35 = vmul.f32 %v2020_v30, %v1387_v32  ;;  %1415 = vst [vmem:[#allocation11 + $0x40] sm:$0xff] %v1387_v32  ;;  %v1738_v32 = vpop.permute.xlu1 %1737 }
 0x87a   :  { %v2193_v36 = vpop.eup %2192  ;;  %v1397_v37 = vmul.f32 %v2021_v33, %v1388_v34  ;;  %1416 = vst [vmem:[#allocation11 + $0x48] sm:$0xff] %v1388_v34 }
 0x87b   :  { %v2195_v39 = vpop.eup %2194  ;;  %v1400_v40 = vadd.f32 %v1396_v35, %v1371_v4  ;;  %v1389_v41 = vadd.f32 0.001, %v2193_v36 }
 0x87c   :  { %v1390_v43 = vadd.f32 0.001, %v2195_v39  ;;  %v1401_v44 = vadd.f32 %v1397_v37, %v1372_v6  ;;  %v1626_v6 = vpop.permute.xlu0 %1625 }
 0x87d   :  { %1405 = vst [vmem:[#allocation8 + $0x40] sm:$0xff] %v1400_v40  ;;  %v1398_v45 = vmul.f32 %v2022_v38, %v1389_v41  ;;  %1417 = vst [vmem:[#allocation11 + $0x50] sm:$0xff] %v1389_v41 }
 0x87e   :  { %v1399_v46 = vmul.f32 %v2023_v42, %v1390_v43  ;;  %1418 = vst [vmem:[#allocation11 + $0x58] sm:$0xff] %v1390_v43  ;;  %1406 = vst [vmem:[#allocation8 + $0x48] sm:$0xff] %v1401_v44 }
 0x87f   :  { %v1402_v47 = vadd.f32 %v1398_v45, %v1373_v11 }
 0x880   :  { %v1403_v48 = vadd.f32 %v1399_v46, %v1374_v12  ;;  %v1743_v24 = vpop.permute.xlu0 %1742 }
 0x881   :  { %1407 = vst [vmem:[#allocation8 + $0x50] sm:$0xff] %v1402_v47  ;;  %v2124_v49 = vpack.c.bf16 %v1402_v47, %v1400_v40 }
 0x882   :  { %1408 = vst [vmem:[#allocation8 + $0x58] sm:$0xff] %v1403_v48  ;;  %v2122_v50 = vpack.c.bf16 %v1403_v48, %v1401_v44 }
 0x884   :  { %2123 = vmatprep.subr.bf16.mxu0 %v2122_v50  ;;  %v1733_v26 = vpop.permute.xlu0 %1732 }
 0x885   :  { %2125 = vmatpush1.bf16.msra.mxu0 %v2124_v49 }
 0x888   :  { %2036 = vmatmul.mubr.msk.f32.vlgmr.msra.gmra.mrb[20].mxu0 %vm198_vm1, %v1528_v51 }
 0x889   :  { %1606 = vmatprep.mubr.f32.mxu0 %v2349_v0 }
 0x88c   :  { %2037 = vmatmul.mubr.msk.f32.gmra.mrb[22].mxu0 %vm198_vm1, %v1529_v52 }
 0x88d   :  { %1826 = vmatprep.mubr.f32.mxu0 %v2349_v0 }
 0x95b   :  { %v1602_v53 = vpop.f32.mrb[20].mxu0 }
 0x95c   :  { %v1604_v54 = vpop.f32.mrb[21].mxu0  ;;  %v2146_v58 = vadd.f32 %v1602_v53, %v1437_v55 }
 0x95d   :  { %v2147_v61 = vadd.f32 %v1604_v54, %v1437_v55 }
 0x95f   :  { %v1608_v57 = vpop.f32.mrb[22].mxu0 }
 0x960   :  { %v2148_v59 = vadd.f32 %v1608_v57, %v1442_v56  ;;  %v1610_v60 = vpop.f32.mrb[23].mxu0 }
 0x961   :  { %v2149_v62 = vadd.f32 %v1610_v60, %v1442_v56 }
 0x962   :  { %v2128_v63 = vpack.c.bf16 %v2148_v59, %v2146_v58 }
 0x963   :  { %v2126_v1 = vpack.c.bf16 %v2149_v62, %v2147_v61 }
 0x965   :  { %2127 = vmatprep.subr.bf16.mxu1 %v2126_v1 }
 0x966   :  { %2129 = vmatpush1.bf16.msra.mxu1 %v2128_v63 }
 0x969   :  { %2040 = vmatmul.mubr.msk.f32.vlgmr.msra.gmra.mrb[32].mxu1 %vm198_vm1, %v1618_v2 }
 0x96a   :  { %1709 = vmatprep.mubr.f32.mxu1 %v2349_v0 }
 0x96d   :  { %2041 = vmatmul.mubr.msk.f32.gmra.mrb[34].mxu1 %vm198_vm1, %v1619_v3 }
 0xa3c   :  { %v1705_v4 = vpop.f32.mrb[32].mxu1 }
 0xa3d   :  { %v1707_v5 = vpop.f32.mrb[33].mxu1  ;;  %v1706_v7 = vadd.f32 %v1705_v4, %v1626_v6 }
 0xa3e   :  { %v1708_v9 = vadd.f32 %v1707_v5, %v1626_v6 }
 0xa3f   :  { %v1716_v14 = vmax.f32 %v1706_v7, 0.0 }
 0xa40   :  { %v1711_v10 = vpop.f32.mrb[34].mxu1  ;;  %v1717_v16 = vmax.f32 %v1708_v9, 0.0 }
 0xa41   :  { %v1712_v11 = vadd.f32 %v1711_v10, %v1631_v8  ;;  %v1713_v12 = vpop.f32.mrb[35].mxu1 }
 0xa42   :  { %v1714_v13 = vadd.f32 %v1713_v12, %v1631_v8 }
 0xa43   :  { %v1718_v15 = vmax.f32 %v1712_v11, 0.0 }
 0xa44   :  { %v1719_v17 = vmax.f32 %v1714_v13, 0.0 }
 0xa45   :  { %v2132_v18 = vpack.c.bf16 %v1718_v15, %v1716_v14 }
 0xa46   :  { %v2130_v19 = vpack.c.bf16 %v1719_v17, %v1717_v16 }
 0xa48   :  { %2131 = vmatprep.subr.bf16.mxu0 %v2130_v19 }
 0xa49   :  { %2133 = vmatpush1.bf16.msra.mxu0 %v2132_v18 }
 0xa4c   :  { %2050 = vmatmul.mubr.msk.f32.vlgmr.msra.gmra.mrb[24].mxu0 %vm198_vm1, %v2042_v20 }
 0xa4d   :  { %1832 = vmatprep.mubr.f32.mxu0 %v2349_v0 }
 0xa50   :  { %2051 = vmatmul.mubr.msk.f32.gmra.mrb[26].mxu0 %vm198_vm1, %v2043_v21 }
 0xa51   :  { %1838 = vmatprep.mubr.f32.mxu0 %v2349_v0 }
 0xa54   :  { %2052 = vmatmul.mubr.msk.f32.gmra.mrb[28].mxu0 %vm198_vm1, %v2044_v22 }
 0xa55   :  { %1844 = vmatprep.mubr.f32.mxu0 %v2349_v0 }
 0xa58   :  { %2053 = vmatmul.mubr.msk.f32.gmra.mrb[30].mxu0 %vm198_vm1, %v2045_v23 }
 0xb1f   :  { %v1828_v27 = vpop.f32.mrb[24].mxu0 }
 0xb20   :  { %v2820_v28 = vadd.f32 %v1828_v27, %v1733_v26  ;;  %v1830_v29 = vpop.f32.mrb[25].mxu0 }
 0xb21   :  { %v2822_v30 = vadd.f32 %v1830_v29, %v1733_v26 }
 0xb22   :  { %v1851_v31 = vmin.f32 %v2820_v28, 10.0 }
 0xb23   :  { %v1852_v0 = vmin.f32 %v2822_v30, 10.0  ;;  %v1834_v33 = vpop.f32.mrb[26].mxu0 }
 0xb24   :  { %1890 = vst [vmem:[#allocation9 + $0x60] sm:$0xff] %v1851_v31  ;;  %v2828_v34 = vadd.f32 %v1834_v33, %v1738_v32  ;;  %v1836_v35 = vpop.f32.mrb[27].mxu0 }
 0xb25   :  { %1891 = vst [vmem:[#allocation9 + $0x68] sm:$0xff] %v1852_v0  ;;  %v2832_v36 = vadd.f32 %v1836_v35, %v1738_v32 }
 0xb26   :  { %v1853_v37 = vmin.f32 %v2828_v34, 10.0 }
 0xb27   :  { %v1854_v38 = vmin.f32 %v2832_v36, 10.0  ;;  %v1840_v39 = vpop.f32.mrb[28].mxu0 }
 0xb28   :  { %1892 = vst [vmem:[#allocation9 + $0x70] sm:$0xff] %v1853_v37  ;;  %v1841_v40 = vadd.f32 %v1840_v39, %v1743_v24  ;;  %v1842_v41 = vpop.f32.mrb[29].mxu0 }
 0xb29   :  { %1893 = vst [vmem:[#allocation9 + $0x78] sm:$0xff] %v1854_v38  ;;  %v1843_v42 = vadd.f32 %v1842_v41, %v1743_v24 }
 0xb2a   :  { %v1855_v43 = vmin.f32 %v1841_v40, 10.0 }
 0xb2b   :  { %2281 = shalt.err (!%p2278_p0)
}
 0xb2c   :  { %s2282_s15 = scalar_lea.hbm %s2915_s10, 2048 }
 0xb2d   :  { %p2283_p1 = scmp.ne.s32.totalorder %s2915_s10, %s2282_s15  ;;  %p2286_p2 = scmp.lt.u32.totalorder %s2282_s15, %s2915_s10 }
 0xb2f   :  { %p2288_p3 = pnand %p2286_p2, %p2283_p1 }
 0xb31   :  { %2291 = shalt.err (!%p2288_p3)
}
 0xb32   :  { %s2352_s19 = smov 256   ;;  %s2353_s0 = smov 16   ;;  %v1856_v44 = vmin.f32 %v1843_v42, 10.0  ;;  %v1846_v45 = vpop.f32.mrb[30].mxu0  ;;  %v1859_v46 = vmul.f32 1.442695, %v1855_v43 }
 0xb33   :  { %1922 = dma.vmem_to_hbm [thread:$0]  %s1917_s28, 2048, %s2915_s10, [#allocation10], %s2352_s19, %s2352_s19, %s2353_s0   ;;  %v1847_v47 = vadd.f32 %v1846_v45, %v1748_v25  ;;  %v1848_v48 = vpop.f32.mrb[31].mxu0 }
 0xb34   :  { %v1861_v49 = vmul.f32 1.442695, %v1856_v44  ;;  %v1849_v50 = vadd.f32 %v1848_v48, %v1748_v25  ;;  %2196 = vpow2.f32 %v1859_v46  ;;  %v2054_v56 = vld [vmem:[%s2906_s1 + $0x60] sm:$0xff]  ;;  %v2055_v59 = vld [vmem:[%s2906_s1 + $0x68] sm:$0xff]  ;;  %s2354_s23 = smov [#allocation11]   ;;  %v2056_v1 = vld [vmem:[%s2906_s1 + $0x70] sm:$0xff] }
 0xb35   :  { %v1857_v51 = vmin.f32 %v1847_v47, 10.0  ;;  %s1928_s3 = sshll.u32 %s2354_s23, 4  ;;  %v2057_v5 = vld [vmem:[%s2906_s1 + $0x78] sm:$0xff]  ;;  %s2355_s27 = smov [#allocation8]   ;;  %s1929_s3 = int_to_ptr.vmem [resolvable:$true] %s1928_s3 }
 0xb36   :  { %2198 = vpow2.f32 %v1861_v49  ;;  %v1858_v52 = vmin.f32 %v1849_v50, 10.0  ;;  %s1904_s4 = sshll.u32 %s2355_s27, 4  ;;  %s2292_s6 = scalar_lea.vmem %s1929_s3, 2048  ;;  %s1905_s4 = int_to_ptr.vmem [resolvable:$true] %s1904_s4 }
 0xb37   :  { %v1863_v53 = vmul.f32 1.442695, %v1857_v51  ;;  %p2293_p4 = scmp.ne.s32.totalorder %s1929_s3, %s2292_s6  ;;  %p2297_p5 = scmp.lt.s32.totalorder %s1929_s3, %s1929_s3 }
 0xb38   :  { %v1865_v54 = vmul.f32 1.442695, %v1858_v52  ;;  %p2298_p6 = scmp.lt.s32.totalorder %s2292_s6, %s2292_s6 }
 0xb39   :  { %2200 = vpow2.f32 %v1863_v53 }
 0xb3a   :  { %2202 = vpow2.f32 %v1865_v54  ;;  %p2299_p7 = por %p2298_p6, %p2297_p5 }
 0xb3c   :  { %p2300_p8 = pnand %p2299_p7, %p2293_p4 }
 0xb3e   :  { %v2197_v55 = vpop.eup %2196 }
 0xb3f   :  { %v1867_v58 = vadd.f32 0.001, %v2197_v55 }
 0xb40   :  { %v2199_v57 = vpop.eup %2198 }
 0xb41   :  { %v1868_v60 = vadd.f32 0.001, %v2199_v57  ;;  %v1876_v61 = vmul.f32 %v2054_v56, %v1867_v58  ;;  %1895 = vst [vmem:[#allocation11 + $0x60] sm:$0xff] %v1867_v58 }
 0xb43   :  { %v2201_v62 = vpop.eup %2200  ;;  %v1877_v63 = vmul.f32 %v2055_v59, %v1868_v60  ;;  %1896 = vst [vmem:[#allocation11 + $0x68] sm:$0xff] %v1868_v60  ;;  %v1880_v3 = vadd.f32 %v1876_v61, %v1851_v31 }
 0xb44   :  { %v2203_v2 = vpop.eup %2202  ;;  %v1869_v4 = vadd.f32 0.001, %v2201_v62 }
 0xb45   :  { %v1881_v6 = vadd.f32 %v1877_v63, %v1852_v0  ;;  %v1870_v7 = vadd.f32 0.001, %v2203_v2  ;;  %1885 = vst [vmem:[#allocation8 + $0x60] sm:$0xff] %v1880_v3 }
 0xb46   :  { %v1878_v8 = vmul.f32 %v2056_v1, %v1869_v4  ;;  %1897 = vst [vmem:[#allocation11 + $0x70] sm:$0xff] %v1869_v4 }
 0xb47   :  { %1886 = vst [vmem:[#allocation8 + $0x68] sm:$0xff] %v1881_v6  ;;  %v1879_v9 = vmul.f32 %v2057_v5, %v1870_v7  ;;  %1898 = vst [vmem:[#allocation11 + $0x78] sm:$0xff] %v1870_v7 }
 0xb48   :  { %v1882_v10 = vadd.f32 %v1878_v8, %v1853_v37 }
 0xb49   :  { %2303 = shalt.err (!%p2300_p8)
}
 0xb4a   :  { %s2304_s7 = scalar_lea.hbm %s2916_s11, 2048 }
 0xb4b   :  { %p2305_p9 = scmp.ne.s32.totalorder %s2916_s11, %s2304_s7  ;;  %p2308_p10 = scmp.lt.u32.totalorder %s2304_s7, %s2916_s11 }
 0xb4d   :  { %p2310_p11 = pnand %p2308_p10, %p2305_p9 }
 0xb4f   :  { %2313 = shalt.err (!%p2310_p11)
}
 0xb50   :  { %1934 = dma.vmem_to_hbm [thread:$0]  %s1929_s3, 2048, %s2916_s11, [#allocation10], %s2352_s19, %s2352_s19, %s2353_s0   ;;  %v1883_v11 = vadd.f32 %v1879_v9, %v1854_v38  ;;  %1887 = vst [vmem:[#allocation8 + $0x70] sm:$0xff] %v1882_v10 }
 0xb51   :  { %s2314_s2 = scalar_lea.vmem %s1905_s4, 2048  ;;  %p2319_p13 = scmp.lt.s32.totalorder %s1905_s4, %s1905_s4 }
 0xb52   :  { %1888 = vst [vmem:[#allocation8 + $0x78] sm:$0xff] %v1883_v11  ;;  %p2315_p12 = scmp.ne.s32.totalorder %s1905_s4, %s2314_s2  ;;  %p2320_p0 = scmp.lt.s32.totalorder %s2314_s2, %s2314_s2 }
 0xb54   :  { %p2321_p1 = por %p2320_p0, %p2319_p13 }
 0xb56   :  { %p2322_p2 = pnand %p2321_p1, %p2315_p12 }
 0xb58   :  { %2325 = shalt.err (!%p2322_p2)
}
 0xb59   :  { %s2326_s21 = scalar_lea.hbm %s2914_s9, 2048 }
 0xb5a   :  { %p2327_p3 = scmp.ne.s32.totalorder %s2914_s9, %s2326_s21  ;;  %p2330_p4 = scmp.lt.u32.totalorder %s2326_s21, %s2914_s9 }
 0xb5c   :  { %p2332_p5 = pnand %p2330_p4, %p2327_p3 }
 0xb5e   :  { %2335 = shalt.err (!%p2332_p5)
}
 0xb5f   :  { %1910 = dma.vmem_to_hbm [thread:$0]  %s1905_s4, 2048, %s2914_s9, [#allocation4], %s2352_s19, %s2352_s19, %s2353_s0  }
 0xb60   :  { %2340 = dma.done.wait [#allocation4], 2048  }
 0xb61   :  { %2341 = vsyncadd [#allocation4], 4294965248 }
 0xb62   :  { %2342 = dma.done.wait [#allocation10], 4096  }
 0xb63   :  { %2343 = vsyncadd [#allocation10], 4294963200 }
 0xb64   :  { %1944 = vsyncpa [#allocation3], 1 }
 0xb65   :  { %1945 = vsyncpa [#allocation6], 1 }
 0xb66   :  { %1946 = vsyncpa [#allocation4], 1 }
 0xb67   :  { %1947 = vsyncpa [#allocation10], 1 }

</bundles_post_ra>
